<compile_context>
chip_gen: v5e
topology: v5e:2x2
jax: 0.10.0
libtpu: 0.0.40
codegen_flags: <defaults>
</compile_context>

<pallas_src>
import numpy as np
import jax
import jax.numpy as jnp
from jax.experimental import pallas as pl
from jax.experimental.pallas import tpu as pltpu


# (Cin, Cout, kernel, stride, pad) -- mirrors inception Conv2d_1a/2a/2b style.
_BLOCK_CFG = [
    (3, 8, 3, 2, 1),    # 32x32 -> 16x16
    (8, 16, 3, 1, 1),   # 16x16 -> 16x16
    (16, 32, 3, 2, 1),  # 16x16 -> 8x8
]
_IN_HW = 32


def _block_out_dims():
    h = w = _IN_HW
    dims = []
    for (_cin, cout, k, s, p) in _BLOCK_CFG:
        h = (h + 2 * p - k) // s + 1
        w = (w + 2 * p - k) // s + 1
        dims.append((h, w, cout))
    return dims


# ----------------------------------------------------------------------------
# Pallas kernel: fused 3-block backbone.  One grid step == one image.
# ----------------------------------------------------------------------------
def _backbone_kernel(x_ref,
                     a1_ref, b1_ref, c1_ref,
                     a2_ref, b2_ref, c2_ref,
                     a3_ref, b3_ref, c3_ref,
                     o_ref):
    """Each conv block computes  relu( sum_i A_i @ X @ B_i + bias ).

    X    : (H, W*Cin)        bf16 feature map (NHWC with W,C flattened on lanes)
    A_i  : (Ho, H)           bf16 0/1 row-selection (vertical tap i, stride, pad)
    B_i  : (W*Cin, Wo*Cout)  bf16 horizontal taps * conv weights * BN scale
    bias : (1, Wo*Cout)      f32  folded BN shift, tiled over Wo
    """

    def conv_block(x, a_ref, b_ref, bias_ref):
        kh = a_ref.shape[0]
        acc = jnp.zeros((a_ref.shape[1], b_ref.shape[2]), jnp.float32)
        for i in range(kh):                       # static unroll over the 3 taps
            # Row selection is exact (0/1 entries) => bf16 round-trip is lossless.
            rows = jnp.dot(a_ref[i], x, preferred_element_type=jnp.float32)
            acc = acc + jnp.dot(rows.astype(jnp.bfloat16), b_ref[i],
                                preferred_element_type=jnp.float32)
        return jnp.maximum(acc + bias_ref[...], 0.0)      # bias + ReLU epilogue

    x = x_ref[0]                                                      # (32, 96)
    h = conv_block(x, a1_ref, b1_ref, c1_ref).astype(jnp.bfloat16)    # (16, 128)
    h = conv_block(h, a2_ref, b2_ref, c2_ref).astype(jnp.bfloat16)    # (16, 256)
    y = conv_block(h, a3_ref, b3_ref, c3_ref)                         # (8, 256) f32
    o_ref[0] = y.astype(o_ref.dtype)                       # lane-dense store


def _backbone_pallas(x2, weights):
    """x2: (B, H, W*Cin) bf16; weights: (A1,B1,c1, A2,B2,c2, A3,B3,c3)."""
    batch, h_in, wc_in = x2.shape
    ho, wo, co = _block_out_dims()[-1]
    out_wc = wo * co

    x_spec = pl.BlockSpec((1, h_in, wc_in), lambda b: (b, 0, 0))
    w_specs = [pl.BlockSpec(w.shape, (lambda b, n=w.ndim: (0,) * n))
               for w in weights]
    out_spec = pl.BlockSpec((1, ho, out_wc), lambda b: (b, 0, 0))

    return pl.pallas_call(
        _backbone_kernel,
        out_shape=jax.ShapeDtypeStruct((batch, ho, out_wc), jnp.float32),
        grid_spec=pltpu.PrefetchScalarGridSpec(
            num_scalar_prefetch=0,
            grid=(batch,),
            in_specs=[x_spec] + w_specs,
            out_specs=out_spec,
        ),
        compiler_params=pltpu.CompilerParams(
            dimension_semantics=("parallel",),     # one image per TC on v7x
            vmem_limit_bytes=32 * 1024 * 1024,
        ),
    )(x2, *weights)


@jax.jit
def encoder_forward(x_nchw, enc_weights):
    """x_nchw: (B, 3, H, W) float32 -> features (B, H'*W', C')."""
    batch, _c, h, w = x_nchw.shape
    # NCHW (PyTorch) -> NHWC -> (B, H, W*C); pure layout plumbing + bf16 cast.
    x = jnp.transpose(x_nchw, (0, 2, 3, 1)).astype(jnp.bfloat16)
    x = x.reshape(batch, h, w * x.shape[-1])
    out = _backbone_pallas(x, enc_weights)                 # (B, Ho, Wo*Cout)
    ho, wo, co = _block_out_dims()[-1]
    # NHWC layout => permute(0,2,3,1).view(B, H*W, C) is a free reshape.
    return out.reshape(batch, ho * wo, co)


# ----------------------------------------------------------------------------
# Parameters: raw BasicConv2d params + one-time offline folding.
# ----------------------------------------------------------------------------
def init_encoder_params(key):
    """Raw per-block params (conv weight, folded BN scale, folded BN bias)."""
    params = []
    eps = 1e-3                                   # inception_v3 BatchNorm eps
    for (cin, cout, k, _s, _p) in _BLOCK_CFG:
        key, kw_, kg, kb, km, kv = jax.random.split(key, 6)
        w = jax.random.normal(kw_, (k, k, cin, cout), jnp.float32) * 0.1
        gamma = 1.0 + 0.1 * jax.random.normal(kg, (cout,), jnp.float32)
        beta = 0.1 * jax.random.normal(kb, (cout,), jnp.float32)
        mean = 0.1 * jax.random.normal(km, (cout,), jnp.float32)
        var = jnp.abs(jax.random.normal(kv, (cout,), jnp.float32)) + 0.5
        scale = gamma / jnp.sqrt(var + eps)      # eval-mode BN, folded
        bias = beta - mean * scale
        params.append((w, scale, bias))
    return params


def fold_encoder_params(raw_params):
    """One-time offline transform: conv + BN  ->  (A_i, B_i, bias) per block.

      A_i[ho, h]                   = [h == s*ho + i - pad]
      B_i[w*Cin+c, wo*Cout+co]     = [w == s*wo + j - pad] * W[i,j,c,co] * bn_scale[co]
      bias[wo*Cout+co]             = beta[co] - mean[co]*bn_scale[co]

    Zero padding is implicit: out-of-range rows/cols simply select nothing.
    """
    h_in = w_in = _IN_HW
    packed = []
    for (w_conv, scale, bias), (cin, cout, k, s, p) in zip(raw_params, _BLOCK_CFG):
        ho = (h_in + 2 * p - k) // s + 1
        wo = (w_in + 2 * p - k) // s + 1
        w_np = np.asarray(w_conv) * np.asarray(scale)[None, None, None, :]
        a_mats = np.zeros((k, ho, h_in), np.float32)
        for i in range(k):
            for r in range(ho):
                h = s * r + i - p
                if 0 <= h < h_in:
                    a_mats[i, r, h] = 1.0
        b_mats = np.zeros((k, w_in * cin, wo * cout), np.float32)
        for i in range(k):
            for oc in range(wo):
                for j in range(k):
                    wcol = s * oc + j - p
                    if 0 <= wcol < w_in:
                        b_mats[i, wcol * cin:(wcol + 1) * cin,
                               oc * cout:(oc + 1) * cout] = w_np[i, j]
        bias_t = np.tile(np.asarray(bias), wo).reshape(1, wo * cout)
        packed += [jnp.asarray(a_mats, jnp.bfloat16),
                   jnp.asarray(b_mats, jnp.bfloat16),
                   jnp.asarray(bias_t, jnp.float32)]
        h_in, w_in = ho, wo
    return tuple(packed)


def _reference_forward(x_nchw, raw_params):
    """Pure-JAX reference (lax.conv) for a correctness check."""
    x = jnp.transpose(x_nchw, (0, 2, 3, 1))                # NHWC
    for (w, scale, bias), (_ci, _co, _k, s, p) in zip(raw_params, _BLOCK_CFG):
        y = jax.lax.conv_general_dilated(
            x, w, window_strides=(s, s), padding=[(p, p), (p, p)],
            dimension_numbers=("NHWC", "HWIO", "NHWC"),
            precision=jax.lax.Precision.HIGHEST)
        x = jnp.maximum(y * scale + bias, 0.0)
    batch, h, w_, c = x.shape
    return x.reshape(batch, h * w_, c)


if __name__ == "__main__":
    key = jax.random.PRNGKey(0)
    kx, kp = jax.random.split(key)
    # PyTorch-convention NCHW input (3 channels, like inception_v3).
    x = jax.random.normal(kx, (2, 3, 32, 32), jnp.float32)

    raw_params = init_encoder_params(kp)
    enc_weights = fold_encoder_params(raw_params)          # offline weight transform

    feats = jax.block_until_ready(encoder_forward(x, enc_weights))

    ho, wo, co = _block_out_dims()[-1]
    assert feats.shape == (x.shape[0], ho * wo, co), feats.shape
    assert bool(jnp.all(jnp.isfinite(feats)))

    ref = jax.block_until_ready(_reference_forward(x, raw_params))
    assert bool(jnp.allclose(feats, ref, rtol=5e-2, atol=5e-2)), (
        float(jnp.max(jnp.abs(feats - ref))))

    print("KERNEL_OK")
</pallas_src>

<mosaic_0001>
module attributes {stable_mosaic.version = 11 : i64} {
  func.func @_backbone_kernel(%arg0: i32, %arg1: memref<1x32x96xbf16, #tpu.memory_space<vmem>>, %arg2: memref<3x16x32xbf16, #tpu.memory_space<vmem>>, %arg3: memref<3x96x128xbf16, #tpu.memory_space<vmem>>, %arg4: memref<1x128xf32, #tpu.memory_space<vmem>>, %arg5: memref<3x16x16xbf16, #tpu.memory_space<vmem>>, %arg6: memref<3x128x256xbf16, #tpu.memory_space<vmem>>, %arg7: memref<1x256xf32, #tpu.memory_space<vmem>>, %arg8: memref<3x8x16xbf16, #tpu.memory_space<vmem>>, %arg9: memref<3x256x256xbf16, #tpu.memory_space<vmem>>, %arg10: memref<1x256xf32, #tpu.memory_space<vmem>>, %arg11: memref<1x8x256xf32, #tpu.memory_space<vmem>>) attributes {dimension_semantics = [#tpu.dimension_semantics<parallel>], iteration_bounds = array<i64: 2>, scalar_prefetch = 0 : i64, scratch_operands = 0 : i64, tpu.core_type = #tpu.core_type<tc>, window_params = [{transform_indices = @transform_0, window_bounds = array<i64: 1, 32, 96>}, {pipeline_mode = #tpu.pipeline_mode<synchronous>, transform_indices = @transform_1, window_bounds = array<i64: 3, 16, 32>}, {pipeline_mode = #tpu.pipeline_mode<synchronous>, transform_indices = @transform_2, window_bounds = array<i64: 3, 96, 128>}, {pipeline_mode = #tpu.pipeline_mode<synchronous>, transform_indices = @transform_3, window_bounds = array<i64: 1, 128>}, {pipeline_mode = #tpu.pipeline_mode<synchronous>, transform_indices = @transform_4, window_bounds = array<i64: 3, 16, 16>}, {pipeline_mode = #tpu.pipeline_mode<synchronous>, transform_indices = @transform_5, window_bounds = array<i64: 3, 128, 256>}, {pipeline_mode = #tpu.pipeline_mode<synchronous>, transform_indices = @transform_6, window_bounds = array<i64: 1, 256>}, {pipeline_mode = #tpu.pipeline_mode<synchronous>, transform_indices = @transform_7, window_bounds = array<i64: 3, 8, 16>}, {pipeline_mode = #tpu.pipeline_mode<synchronous>, transform_indices = @transform_8, window_bounds = array<i64: 3, 256, 256>}, {pipeline_mode = #tpu.pipeline_mode<synchronous>, transform_indices = @transform_9, window_bounds = array<i64: 1, 256>}, {transform_indices = @transform_10, window_bounds = array<i64: 1, 8, 256>}]} {
    %c0 = arith.constant 0 : index
    %c0_0 = arith.constant 0 : index
    %c0_1 = arith.constant 0 : index
    %0 = vector.load %arg1[%c0, %c0_0, %c0_1] : memref<1x32x96xbf16, #tpu.memory_space<vmem>>, vector<1x32x96xbf16>
    %1 = vector.shape_cast %0 : vector<1x32x96xbf16> to vector<32x96xbf16>
    %cst = arith.constant 0.000000e+00 : f32
    %2 = vector.broadcast %cst : f32 to vector<16x128xf32>
    %c0_2 = arith.constant 0 : index
    %c0_3 = arith.constant 0 : index
    %c0_4 = arith.constant 0 : index
    %3 = vector.load %arg2[%c0_2, %c0_3, %c0_4] : memref<3x16x32xbf16, #tpu.memory_space<vmem>>, vector<1x16x32xbf16>
    %4 = vector.shape_cast %3 : vector<1x16x32xbf16> to vector<16x32xbf16>
    %cst_5 = arith.constant dense<0.000000e+00> : vector<16x96xf32>
    %5 = tpu.matmul %4, %1, %cst_5 {dimension_numbers = #tpu.dot_dimension_numbers<[1], [0], [0], [1], [0, 0, 1, 1], [], []>} : vector<16x32xbf16>, vector<32x96xbf16>, vector<16x96xf32> -> vector<16x96xf32>
    %6 = arith.truncf %5 : vector<16x96xf32> to vector<16x96xbf16>
    %c0_6 = arith.constant 0 : index
    %c0_7 = arith.constant 0 : index
    %c0_8 = arith.constant 0 : index
    %7 = vector.load %arg3[%c0_6, %c0_7, %c0_8] : memref<3x96x128xbf16, #tpu.memory_space<vmem>>, vector<1x96x128xbf16>
    %8 = vector.shape_cast %7 : vector<1x96x128xbf16> to vector<96x128xbf16>
    %cst_9 = arith.constant dense<0.000000e+00> : vector<16x128xf32>
    %9 = tpu.matmul %6, %8, %cst_9 {dimension_numbers = #tpu.dot_dimension_numbers<[1], [0], [0], [1], [0, 0, 1, 1], [], []>} : vector<16x96xbf16>, vector<96x128xbf16>, vector<16x128xf32> -> vector<16x128xf32>
    %10 = arith.addf %2, %9 : vector<16x128xf32>
    %c1 = arith.constant 1 : index
    %c0_10 = arith.constant 0 : index
    %c0_11 = arith.constant 0 : index
    %11 = vector.load %arg2[%c1, %c0_10, %c0_11] : memref<3x16x32xbf16, #tpu.memory_space<vmem>>, vector<1x16x32xbf16>
    %12 = vector.shape_cast %11 : vector<1x16x32xbf16> to vector<16x32xbf16>
    %cst_12 = arith.constant dense<0.000000e+00> : vector<16x96xf32>
    %13 = tpu.matmul %12, %1, %cst_12 {dimension_numbers = #tpu.dot_dimension_numbers<[1], [0], [0], [1], [0, 0, 1, 1], [], []>} : vector<16x32xbf16>, vector<32x96xbf16>, vector<16x96xf32> -> vector<16x96xf32>
    %14 = arith.truncf %13 : vector<16x96xf32> to vector<16x96xbf16>
    %c1_13 = arith.constant 1 : index
    %c0_14 = arith.constant 0 : index
    %c0_15 = arith.constant 0 : index
    %15 = vector.load %arg3[%c1_13, %c0_14, %c0_15] : memref<3x96x128xbf16, #tpu.memory_space<vmem>>, vector<1x96x128xbf16>
    %16 = vector.shape_cast %15 : vector<1x96x128xbf16> to vector<96x128xbf16>
    %cst_16 = arith.constant dense<0.000000e+00> : vector<16x128xf32>
    %17 = tpu.matmul %14, %16, %cst_16 {dimension_numbers = #tpu.dot_dimension_numbers<[1], [0], [0], [1], [0, 0, 1, 1], [], []>} : vector<16x96xbf16>, vector<96x128xbf16>, vector<16x128xf32> -> vector<16x128xf32>
    %18 = arith.addf %10, %17 : vector<16x128xf32>
    %c2 = arith.constant 2 : index
    %c0_17 = arith.constant 0 : index
    %c0_18 = arith.constant 0 : index
    %19 = vector.load %arg2[%c2, %c0_17, %c0_18] : memref<3x16x32xbf16, #tpu.memory_space<vmem>>, vector<1x16x32xbf16>
    %20 = vector.shape_cast %19 : vector<1x16x32xbf16> to vector<16x32xbf16>
    %cst_19 = arith.constant dense<0.000000e+00> : vector<16x96xf32>
    %21 = tpu.matmul %20, %1, %cst_19 {dimension_numbers = #tpu.dot_dimension_numbers<[1], [0], [0], [1], [0, 0, 1, 1], [], []>} : vector<16x32xbf16>, vector<32x96xbf16>, vector<16x96xf32> -> vector<16x96xf32>
    %22 = arith.truncf %21 : vector<16x96xf32> to vector<16x96xbf16>
    %c2_20 = arith.constant 2 : index
    %c0_21 = arith.constant 0 : index
    %c0_22 = arith.constant 0 : index
    %23 = vector.load %arg3[%c2_20, %c0_21, %c0_22] : memref<3x96x128xbf16, #tpu.memory_space<vmem>>, vector<1x96x128xbf16>
    %24 = vector.shape_cast %23 : vector<1x96x128xbf16> to vector<96x128xbf16>
    %cst_23 = arith.constant dense<0.000000e+00> : vector<16x128xf32>
    %25 = tpu.matmul %22, %24, %cst_23 {dimension_numbers = #tpu.dot_dimension_numbers<[1], [0], [0], [1], [0, 0, 1, 1], [], []>} : vector<16x96xbf16>, vector<96x128xbf16>, vector<16x128xf32> -> vector<16x128xf32>
    %26 = arith.addf %18, %25 : vector<16x128xf32>
    %c0_24 = arith.constant 0 : index
    %c0_25 = arith.constant 0 : index
    %27 = vector.load %arg4[%c0_24, %c0_25] : memref<1x128xf32, #tpu.memory_space<vmem>>, vector<1x128xf32>
    %28 = vector.broadcast %27 : vector<1x128xf32> to vector<16x128xf32>
    %29 = arith.addf %26, %28 : vector<16x128xf32>
    %cst_26 = arith.constant 0.000000e+00 : f32
    %30 = vector.broadcast %cst_26 : f32 to vector<16x128xf32>
    %31 = arith.maximumf %29, %30 : vector<16x128xf32>
    %32 = arith.truncf %31 : vector<16x128xf32> to vector<16x128xbf16>
    %cst_27 = arith.constant 0.000000e+00 : f32
    %33 = vector.broadcast %cst_27 : f32 to vector<16x256xf32>
    %c0_28 = arith.constant 0 : index
    %c0_29 = arith.constant 0 : index
    %c0_30 = arith.constant 0 : index
    %34 = vector.load %arg5[%c0_28, %c0_29, %c0_30] : memref<3x16x16xbf16, #tpu.memory_space<vmem>>, vector<1x16x16xbf16>
    %35 = vector.shape_cast %34 : vector<1x16x16xbf16> to vector<16x16xbf16>
    %cst_31 = arith.constant dense<0.000000e+00> : vector<16x128xf32>
    %36 = tpu.matmul %35, %32, %cst_31 {dimension_numbers = #tpu.dot_dimension_numbers<[1], [0], [0], [1], [0, 0, 1, 1], [], []>} : vector<16x16xbf16>, vector<16x128xbf16>, vector<16x128xf32> -> vector<16x128xf32>
    %37 = arith.truncf %36 : vector<16x128xf32> to vector<16x128xbf16>
    %c0_32 = arith.constant 0 : index
    %c0_33 = arith.constant 0 : index
    %c0_34 = arith.constant 0 : index
    %38 = vector.load %arg6[%c0_32, %c0_33, %c0_34] : memref<3x128x256xbf16, #tpu.memory_space<vmem>>, vector<1x128x256xbf16>
    %39 = vector.shape_cast %38 : vector<1x128x256xbf16> to vector<128x256xbf16>
    %cst_35 = arith.constant dense<0.000000e+00> : vector<16x256xf32>
    %40 = tpu.matmul %37, %39, %cst_35 {dimension_numbers = #tpu.dot_dimension_numbers<[1], [0], [0], [1], [0, 0, 1, 1], [], []>} : vector<16x128xbf16>, vector<128x256xbf16>, vector<16x256xf32> -> vector<16x256xf32>
    %41 = arith.addf %33, %40 : vector<16x256xf32>
    %c1_36 = arith.constant 1 : index
    %c0_37 = arith.constant 0 : index
    %c0_38 = arith.constant 0 : index
    %42 = vector.load %arg5[%c1_36, %c0_37, %c0_38] : memref<3x16x16xbf16, #tpu.memory_space<vmem>>, vector<1x16x16xbf16>
    %43 = vector.shape_cast %42 : vector<1x16x16xbf16> to vector<16x16xbf16>
    %cst_39 = arith.constant dense<0.000000e+00> : vector<16x128xf32>
    %44 = tpu.matmul %43, %32, %cst_39 {dimension_numbers = #tpu.dot_dimension_numbers<[1], [0], [0], [1], [0, 0, 1, 1], [], []>} : vector<16x16xbf16>, vector<16x128xbf16>, vector<16x128xf32> -> vector<16x128xf32>
    %45 = arith.truncf %44 : vector<16x128xf32> to vector<16x128xbf16>
    %c1_40 = arith.constant 1 : index
    %c0_41 = arith.constant 0 : index
    %c0_42 = arith.constant 0 : index
    %46 = vector.load %arg6[%c1_40, %c0_41, %c0_42] : memref<3x128x256xbf16, #tpu.memory_space<vmem>>, vector<1x128x256xbf16>
    %47 = vector.shape_cast %46 : vector<1x128x256xbf16> to vector<128x256xbf16>
    %cst_43 = arith.constant dense<0.000000e+00> : vector<16x256xf32>
    %48 = tpu.matmul %45, %47, %cst_43 {dimension_numbers = #tpu.dot_dimension_numbers<[1], [0], [0], [1], [0, 0, 1, 1], [], []>} : vector<16x128xbf16>, vector<128x256xbf16>, vector<16x256xf32> -> vector<16x256xf32>
    %49 = arith.addf %41, %48 : vector<16x256xf32>
    %c2_44 = arith.constant 2 : index
    %c0_45 = arith.constant 0 : index
    %c0_46 = arith.constant 0 : index
    %50 = vector.load %arg5[%c2_44, %c0_45, %c0_46] : memref<3x16x16xbf16, #tpu.memory_space<vmem>>, vector<1x16x16xbf16>
    %51 = vector.shape_cast %50 : vector<1x16x16xbf16> to vector<16x16xbf16>
    %cst_47 = arith.constant dense<0.000000e+00> : vector<16x128xf32>
    %52 = tpu.matmul %51, %32, %cst_47 {dimension_numbers = #tpu.dot_dimension_numbers<[1], [0], [0], [1], [0, 0, 1, 1], [], []>} : vector<16x16xbf16>, vector<16x128xbf16>, vector<16x128xf32> -> vector<16x128xf32>
    %53 = arith.truncf %52 : vector<16x128xf32> to vector<16x128xbf16>
    %c2_48 = arith.constant 2 : index
    %c0_49 = arith.constant 0 : index
    %c0_50 = arith.constant 0 : index
    %54 = vector.load %arg6[%c2_48, %c0_49, %c0_50] : memref<3x128x256xbf16, #tpu.memory_space<vmem>>, vector<1x128x256xbf16>
    %55 = vector.shape_cast %54 : vector<1x128x256xbf16> to vector<128x256xbf16>
    %cst_51 = arith.constant dense<0.000000e+00> : vector<16x256xf32>
    %56 = tpu.matmul %53, %55, %cst_51 {dimension_numbers = #tpu.dot_dimension_numbers<[1], [0], [0], [1], [0, 0, 1, 1], [], []>} : vector<16x128xbf16>, vector<128x256xbf16>, vector<16x256xf32> -> vector<16x256xf32>
    %57 = arith.addf %49, %56 : vector<16x256xf32>
    %c0_52 = arith.constant 0 : index
    %c0_53 = arith.constant 0 : index
    %58 = vector.load %arg7[%c0_52, %c0_53] : memref<1x256xf32, #tpu.memory_space<vmem>>, vector<1x256xf32>
    %59 = vector.broadcast %58 : vector<1x256xf32> to vector<16x256xf32>
    %60 = arith.addf %57, %59 : vector<16x256xf32>
    %cst_54 = arith.constant 0.000000e+00 : f32
    %61 = vector.broadcast %cst_54 : f32 to vector<16x256xf32>
    %62 = arith.maximumf %60, %61 : vector<16x256xf32>
    %63 = arith.truncf %62 : vector<16x256xf32> to vector<16x256xbf16>
    %cst_55 = arith.constant 0.000000e+00 : f32
    %64 = vector.broadcast %cst_55 : f32 to vector<8x256xf32>
    %c0_56 = arith.constant 0 : index
    %c0_57 = arith.constant 0 : index
    %c0_58 = arith.constant 0 : index
    %65 = vector.load %arg8[%c0_56, %c0_57, %c0_58] : memref<3x8x16xbf16, #tpu.memory_space<vmem>>, vector<1x8x16xbf16>
    %66 = vector.shape_cast %65 : vector<1x8x16xbf16> to vector<8x16xbf16>
    %cst_59 = arith.constant dense<0.000000e+00> : vector<8x256xf32>
    %67 = tpu.matmul %66, %63, %cst_59 {dimension_numbers = #tpu.dot_dimension_numbers<[1], [0], [0], [1], [0, 0, 1, 1], [], []>} : vector<8x16xbf16>, vector<16x256xbf16>, vector<8x256xf32> -> vector<8x256xf32>
    %68 = arith.truncf %67 : vector<8x256xf32> to vector<8x256xbf16>
    %c0_60 = arith.constant 0 : index
    %c0_61 = arith.constant 0 : index
    %c0_62 = arith.constant 0 : index
    %69 = vector.load %arg9[%c0_60, %c0_61, %c0_62] : memref<3x256x256xbf16, #tpu.memory_space<vmem>>, vector<1x256x256xbf16>
    %70 = vector.shape_cast %69 : vector<1x256x256xbf16> to vector<256x256xbf16>
    %cst_63 = arith.constant dense<0.000000e+00> : vector<8x256xf32>
    %71 = tpu.matmul %68, %70, %cst_63 {dimension_numbers = #tpu.dot_dimension_numbers<[1], [0], [0], [1], [0, 0, 1, 1], [], []>} : vector<8x256xbf16>, vector<256x256xbf16>, vector<8x256xf32> -> vector<8x256xf32>
    %72 = arith.addf %64, %71 : vector<8x256xf32>
    %c1_64 = arith.constant 1 : index
    %c0_65 = arith.constant 0 : index
    %c0_66 = arith.constant 0 : index
    %73 = vector.load %arg8[%c1_64, %c0_65, %c0_66] : memref<3x8x16xbf16, #tpu.memory_space<vmem>>, vector<1x8x16xbf16>
    %74 = vector.shape_cast %73 : vector<1x8x16xbf16> to vector<8x16xbf16>
    %cst_67 = arith.constant dense<0.000000e+00> : vector<8x256xf32>
    %75 = tpu.matmul %74, %63, %cst_67 {dimension_numbers = #tpu.dot_dimension_numbers<[1], [0], [0], [1], [0, 0, 1, 1], [], []>} : vector<8x16xbf16>, vector<16x256xbf16>, vector<8x256xf32> -> vector<8x256xf32>
    %76 = arith.truncf %75 : vector<8x256xf32> to vector<8x256xbf16>
    %c1_68 = arith.constant 1 : index
    %c0_69 = arith.constant 0 : index
    %c0_70 = arith.constant 0 : index
    %77 = vector.load %arg9[%c1_68, %c0_69, %c0_70] : memref<3x256x256xbf16, #tpu.memory_space<vmem>>, vector<1x256x256xbf16>
    %78 = vector.shape_cast %77 : vector<1x256x256xbf16> to vector<256x256xbf16>
    %cst_71 = arith.constant dense<0.000000e+00> : vector<8x256xf32>
    %79 = tpu.matmul %76, %78, %cst_71 {dimension_numbers = #tpu.dot_dimension_numbers<[1], [0], [0], [1], [0, 0, 1, 1], [], []>} : vector<8x256xbf16>, vector<256x256xbf16>, vector<8x256xf32> -> vector<8x256xf32>
    %80 = arith.addf %72, %79 : vector<8x256xf32>
    %c2_72 = arith.constant 2 : index
    %c0_73 = arith.constant 0 : index
    %c0_74 = arith.constant 0 : index
    %81 = vector.load %arg8[%c2_72, %c0_73, %c0_74] : memref<3x8x16xbf16, #tpu.memory_space<vmem>>, vector<1x8x16xbf16>
    %82 = vector.shape_cast %81 : vector<1x8x16xbf16> to vector<8x16xbf16>
    %cst_75 = arith.constant dense<0.000000e+00> : vector<8x256xf32>
    %83 = tpu.matmul %82, %63, %cst_75 {dimension_numbers = #tpu.dot_dimension_numbers<[1], [0], [0], [1], [0, 0, 1, 1], [], []>} : vector<8x16xbf16>, vector<16x256xbf16>, vector<8x256xf32> -> vector<8x256xf32>
    %84 = arith.truncf %83 : vector<8x256xf32> to vector<8x256xbf16>
    %c2_76 = arith.constant 2 : index
    %c0_77 = arith.constant 0 : index
    %c0_78 = arith.constant 0 : index
    %85 = vector.load %arg9[%c2_76, %c0_77, %c0_78] : memref<3x256x256xbf16, #tpu.memory_space<vmem>>, vector<1x256x256xbf16>
    %86 = vector.shape_cast %85 : vector<1x256x256xbf16> to vector<256x256xbf16>
    %cst_79 = arith.constant dense<0.000000e+00> : vector<8x256xf32>
    %87 = tpu.matmul %84, %86, %cst_79 {dimension_numbers = #tpu.dot_dimension_numbers<[1], [0], [0], [1], [0, 0, 1, 1], [], []>} : vector<8x256xbf16>, vector<256x256xbf16>, vector<8x256xf32> -> vector<8x256xf32>
    %88 = arith.addf %80, %87 : vector<8x256xf32>
    %c0_80 = arith.constant 0 : index
    %c0_81 = arith.constant 0 : index
    %89 = vector.load %arg10[%c0_80, %c0_81] : memref<1x256xf32, #tpu.memory_space<vmem>>, vector<1x256xf32>
    %90 = vector.broadcast %89 : vector<1x256xf32> to vector<8x256xf32>
    %91 = arith.addf %88, %90 : vector<8x256xf32>
    %cst_82 = arith.constant 0.000000e+00 : f32
    %92 = vector.broadcast %cst_82 : f32 to vector<8x256xf32>
    %93 = arith.maximumf %91, %92 : vector<8x256xf32>
    %c0_83 = arith.constant 0 : index
    %c0_84 = arith.constant 0 : index
    %c0_85 = arith.constant 0 : index
    %94 = vector.load %arg11[%c0_83, %c0_84, %c0_85] : memref<1x8x256xf32, #tpu.memory_space<vmem>>, vector<1x8x256xf32>
    %95 = vector.shape_cast %94 : vector<1x8x256xf32> to vector<8x256xf32>
    %96 = vector.shape_cast %93 : vector<8x256xf32> to vector<1x8x256xf32>
    tpu.vector_store %arg11[%c0_83, %c0_84, %c0_85], %96 {strides = array<i32>} : memref<1x8x256xf32, #tpu.memory_space<vmem>>, vector<1x8x256xf32>,
    return
  }
  func.func @transform_0(%arg0: i32) -> (i32, i32, i32) {
    %c0_i32 = arith.constant 0 : i32
    %c0_i32_0 = arith.constant 0 : i32
    %c0_i32_1 = arith.constant 0 : i32
    return %arg0, %c0_i32, %c0_i32_0 : i32, i32, i32
  }
  func.func @transform_1(%arg0: i32) -> (i32, i32, i32) {
    %c0_i32 = arith.constant 0 : i32
    %c0_i32_0 = arith.constant 0 : i32
    %c0_i32_1 = arith.constant 0 : i32
    %c0_i32_2 = arith.constant 0 : i32
    return %c0_i32, %c0_i32_0, %c0_i32_1 : i32, i32, i32
  }
  func.func @transform_2(%arg0: i32) -> (i32, i32, i32) {
    %c0_i32 = arith.constant 0 : i32
    %c0_i32_0 = arith.constant 0 : i32
    %c0_i32_1 = arith.constant 0 : i32
    %c0_i32_2 = arith.constant 0 : i32
    return %c0_i32, %c0_i32_0, %c0_i32_1 : i32, i32, i32
  }
  func.func @transform_3(%arg0: i32) -> (i32, i32) {
    %c0_i32 = arith.constant 0 : i32
    %c0_i32_0 = arith.constant 0 : i32
    %c0_i32_1 = arith.constant 0 : i32
    return %c0_i32, %c0_i32_0 : i32, i32
  }
  func.func @transform_4(%arg0: i32) -> (i32, i32, i32) {
    %c0_i32 = arith.constant 0 : i32
    %c0_i32_0 = arith.constant 0 : i32
    %c0_i32_1 = arith.constant 0 : i32
    %c0_i32_2 = arith.constant 0 : i32
    return %c0_i32, %c0_i32_0, %c0_i32_1 : i32, i32, i32
  }
  func.func @transform_5(%arg0: i32) -> (i32, i32, i32) {
    %c0_i32 = arith.constant 0 : i32
    %c0_i32_0 = arith.constant 0 : i32
    %c0_i32_1 = arith.constant 0 : i32
    %c0_i32_2 = arith.constant 0 : i32
    return %c0_i32, %c0_i32_0, %c0_i32_1 : i32, i32, i32
  }
  func.func @transform_6(%arg0: i32) -> (i32, i32) {
    %c0_i32 = arith.constant 0 : i32
    %c0_i32_0 = arith.constant 0 : i32
    %c0_i32_1 = arith.constant 0 : i32
    return %c0_i32, %c0_i32_0 : i32, i32
  }
  func.func @transform_7(%arg0: i32) -> (i32, i32, i32) {
    %c0_i32 = arith.constant 0 : i32
    %c0_i32_0 = arith.constant 0 : i32
    %c0_i32_1 = arith.constant 0 : i32
    %c0_i32_2 = arith.constant 0 : i32
    return %c0_i32, %c0_i32_0, %c0_i32_1 : i32, i32, i32
  }
  func.func @transform_8(%arg0: i32) -> (i32, i32, i32) {
    %c0_i32 = arith.constant 0 : i32
    %c0_i32_0 = arith.constant 0 : i32
    %c0_i32_1 = arith.constant 0 : i32
    %c0_i32_2 = arith.constant 0 : i32
    return %c0_i32, %c0_i32_0, %c0_i32_1 : i32, i32, i32
  }
  func.func @transform_9(%arg0: i32) -> (i32, i32) {
    %c0_i32 = arith.constant 0 : i32
    %c0_i32_0 = arith.constant 0 : i32
    %c0_i32_1 = arith.constant 0 : i32
    return %c0_i32, %c0_i32_0 : i32, i32
  }
  func.func @transform_10(%arg0: i32) -> (i32, i32, i32) {
    %c0_i32 = arith.constant 0 : i32
    %c0_i32_0 = arith.constant 0 : i32
    %c0_i32_1 = arith.constant 0 : i32
    return %arg0, %c0_i32, %c0_i32_0 : i32, i32, i32
  }
}

</mosaic_0001>

<bundles_post_ra>
// kernel: encoder_forward.1
= control target key start
LH: loop header
LB: loop body
LE: loop exit
PB: predicated region body
PF: predicated region fallthrough
CT: control target
= control target key end

     0   :  { %15 = vsyncpa [#allocation3], 0  ;;  %s3134_s13 = smov 0   ;;  %s3558_s0 = inlined_call_operand.vmem [shape: bf16[2,32,96], index: 0, kind: input, shape index: {}]   ;;  %s3559_s1 = inlined_call_operand.vmem [shape: bf16[3,16,32], index: 1, kind: input, shape index: {}]   ;;  %s3560_s2 = inlined_call_operand.vmem [shape: bf16[3,96,128], index: 2, kind: input, shape index: {}]   ;;  %s3561_s3 = inlined_call_operand.vmem [shape: f32[1,128], index: 3, kind: input, shape index: {}]   ;;  %s3562_s4 = inlined_call_operand.vmem [shape: bf16[3,16,16], index: 4, kind: input, shape index: {}]   ;;  %s3563_s5 = inlined_call_operand.vmem [shape: bf16[3,128,256], index: 5, kind: input, shape index: {}]   ;;  %s3564_s6 = inlined_call_operand.vmem [shape: f32[1,256], index: 6, kind: input, shape index: {}]   ;;  %s3565_s7 = inlined_call_operand.vmem [shape: bf16[3,8,16], index: 7, kind: input, shape index: {}]   ;;  %s3566_s8 = inlined_call_operand.hbm [shape: bf16[3,256,256], index: 8, kind: input, shape index: {}]   ;;  %s3567_s9 = inlined_call_operand.vmem [shape: f32[1,256], index: 9, kind: input, shape index: {}]   ;;  %s3568_s10 = inlined_call_operand.vmem [shape: f32[2,8,256], index: 10, kind: output, shape index: {}]  }
   0x1 LB: > { %s299_s16 = sshll.u32 %s3566_s8, 4  ;;  %s2066_s17 = sadd.s32 4294967295, %s3074_s13   ;;  %s3074_s13 = sphi %s3134_s13, %s21_s13   ;;  %s300_s16 = int_to_ptr.hbm [resolvable:$true] %s299_s16 }
   0x2   : > { %p2068_p0 = scmp.ge.s32.totalorder %s3074_s13, 1  ;;  %p267_p1 = scmp.lt.s32.totalorder %s3074_s13, 3 }
   0x3   : > { %p3020_p2 = scmp.eq.s32.totalorder %s2066_s17, 0  ;;  %s3076_s18 = smov [#allocation2]  }
   0x4   : > { %p268_p3 = pnand %p2068_p0, %p267_p1  ;;  %s301_s19 = sshll.u32 %s3076_s18, 4  ;;  %s302_s19 = int_to_ptr.vmem [resolvable:$true] %s301_s19 }
   0x5   : > { %s3077_s20 = smov 128   ;;  %s3078_s21 = smov 8  }
   0x6   : > { %p3016_p4 = pneg %p268_p3  ;;  %328 = sbr.rel (%p268_p3) target bundleno = 1216 (0x4c0), region = 60 }
   0x8   : > { %p3017_p5 = pnand %p3020_p2, %p3016_p4 }
   0xa   : > { %3019 = dma.hbm_to_vmem [thread:$0]  (!%p3017_p5), %s300_s16, 12288, %s302_s19, [#allocation3], %s3077_s20, %s3077_s20, %s3078_s21  }
   0xb   : > { %3069 = dma.done.wait (%p3020_p2), [#allocation3], 12288  }
   0xc   : > { %3071 = vsyncadd (%p3020_p2), [#allocation3], 4294955008  ;;  %p367_p6 = scmp.lt.s32.totalorder %s2066_s17, 1  ;;  %v2857_v2 = vld [vmem:[%s3560_s2 + $0x58] sm:$0xff]  ;;  %v2850_v3 = vld [vmem:[%s3560_s2 + $0x28] sm:$0xff]  ;;  %vm401_vm0 = vcmask 261120  }
   0xd   : > { %v2864_v4 = vld [vmem:[%s3560_s2 + $0x88] sm:$0xff]  ;;  %v2844_v5 = vld [vmem:[%s3559_s1] sm:$0xff]  ;;  %566 = vmatpush.bf16.msra.mxu3 %v2850_v3  ;;  %v2858_v7 = vld [vmem:[%s3559_s1 + $0x10] sm:$0xff]  ;;  %vm507_vm1 = vcmask 785408   ;;  %vm688_vm2 = vcmask 130048  }
   0xe   : > { %s3570_s17 = smov (!%p367_p6, %s2066_s17), 1  ;;  %v2851_v6 = vld [vmem:[%s3559_s1 + $0x8] sm:$0xff]  ;;  %v2849_v8 = vld [vmem:[%s3560_s2 + $0x20] sm:$0xff]  ;;  %v2856_v9 = vld [vmem:[%s3560_s2 + $0x50] sm:$0xff] }
   0xf   : > { %s2840_s22 = sshll.u32 %s3570_s17, 4  ;;  %v2863_v10 = vld [vmem:[%s3560_s2 + $0x80] sm:$0xff]  ;;  %v2855_v11 = vld [vmem:[%s3560_s2 + $0x48] sm:$0xff]  ;;  %v2862_v12 = vld [vmem:[%s3560_s2 + $0x78] sm:$0xff] }
  0x10   : > { %s371_s25 = scalar_lea.vmem %s3558_s0, %s2840_s22  ;;  %v2854_v13 = vld [vmem:[%s3560_s2 + $0x40] sm:$0xff]  ;;  %v2861_v14 = vld [vmem:[%s3560_s2 + $0x70] sm:$0xff]  ;;  %v2848_v15 = vld [vmem:[%s3560_s2 + $0x18] sm:$0xff] }
  0x11   : > { %v2843_v0 = vld [vmem:[%s371_s25 + $0x8] sm:$0xff]  ;;  %v2842_v1 = vld [vmem:[%s371_s25] sm:$0xff]  ;;  %567 = vmatpush.bf16.msra.mxu3 %v2849_v8  ;;  %v2853_v16 = vld [vmem:[%s3560_s2 + $0x38] sm:$0xff]  ;;  %s376_s25 = scalar_lea.vmem %s3568_s10, %s2840_s22 }
  0x12   : > { %411 = vmatpush.bf16.msra.mxu2 %v2843_v0  ;;  %449 = vmatpush.bf16.msra.mxu1 %v2843_v0  ;;  %v2860_v17 = vld [vmem:[%s3560_s2 + $0x68] sm:$0xff]  ;;  %v2847_v18 = vld [vmem:[%s3560_s2 + $0x10] sm:$0xff]  ;;  %v2859_v20 = vld [vmem:[%s3560_s2 + $0x60] sm:$0xff] }
  0x13   : > { %595 = vmatpush.bf16.msra.mxu0 %v2843_v0  ;;  %v2852_v19 = vld [vmem:[%s3560_s2 + $0x30] sm:$0xff]  ;;  %v2846_v21 = vld [vmem:[%s3560_s2 + $0x8] sm:$0xff]  ;;  %v2845_v22 = vld [vmem:[%s3560_s2] sm:$0xff] }
  0x14   : > { %v2289_v32 = vld [vmem:[%s3563_s5 + $0xf0] sm:$0xf]  ;;  %v2898_v33 = vld [vmem:[%s3563_s5 + $0xf4] sm:$0xf0]  ;;  %v2281_v35 = vld [vmem:[%s3563_s5 + $0xe0] sm:$0xf] }
  0x15   : > { %568 = vmatpush.bf16.msra.mxu3 %v2848_v15  ;;  %v2290_v34 = vor.u32 %v2898_v33, %v2289_v32  ;;  %v2896_v36 = vld [vmem:[%s3563_s5 + $0xe4] sm:$0xf0]  ;;  %v2273_v38 = vld [vmem:[%s3563_s5 + $0xd0] sm:$0xf]  ;;  %v2894_v39 = vld [vmem:[%s3563_s5 + $0xd4] sm:$0xf0] }
  0x16   : > { %412 = vmatpush.bf16.msra.mxu2 %v2842_v1  ;;  %450 = vmatpush.bf16.msra.mxu1 %v2842_v1  ;;  %v2282_v37 = vor.u32 %v2896_v36, %v2281_v35  ;;  %v2274_v40 = vor.u32 %v2894_v39, %v2273_v38  ;;  %v2265_v41 = vld [vmem:[%s3563_s5 + $0xc0] sm:$0xf]  ;;  %v2892_v42 = vld [vmem:[%s3563_s5 + $0xc4] sm:$0xf0]  ;;  %v2257_v44 = vld [vmem:[%s3563_s5 + $0xb0] sm:$0xf] }
  0x17   : > { %596 = vmatpush.bf16.msra.mxu0 %v2842_v1  ;;  %v2266_v43 = vor.u32 %v2892_v42, %v2265_v41  ;;  %v2890_v45 = vld [vmem:[%s3563_s5 + $0xb4] sm:$0xf0]  ;;  %v2249_v47 = vld [vmem:[%s3563_s5 + $0xa0] sm:$0xf]  ;;  %v2888_v48 = vld [vmem:[%s3563_s5 + $0xa4] sm:$0xf0] }
  0x18   : > { %v2258_v46 = vor.u32 %v2890_v45, %v2257_v44  ;;  %v2250_v49 = vor.u32 %v2888_v48, %v2249_v47  ;;  %v2241_v50 = vld [vmem:[%s3563_s5 + $0x90] sm:$0xf]  ;;  %v2886_v51 = vld [vmem:[%s3563_s5 + $0x94] sm:$0xf0]  ;;  %v2233_v53 = vld [vmem:[%s3563_s5 + $0x80] sm:$0xf] }
  0x19   : > { %2089 = vmatmul.msk.bf16.vlgmr.msra.gmra.mxu2 %vm401_vm0, %v2844_v5  ;;  %2096 = vmatmul.msk.bf16.vlgmr.msra.gmra.mxu1 %vm401_vm0, %v2851_v6  ;;  %v2242_v52 = vor.u32 %v2886_v51, %v2241_v50  ;;  %v2884_v54 = vld [vmem:[%s3563_s5 + $0x84] sm:$0xf0]  ;;  %v2897_v56 = vld [vmem:[%s3563_s5 + $0xf4] sm:$0xf]  ;;  %v2291_v57 = vld [vmem:[%s3563_s5 + $0xf8] sm:$0xf0] }
  0x1a   : > { %513 = vmatpush.bf16.msrb.mxu2 %v2857_v2  ;;  %658 = vmatpush.bf16.msrb.mxu1 %v2864_v4  ;;  %v2234_v55 = vor.u32 %v2884_v54, %v2233_v53  ;;  %v2294_v58 = vor.u32 %v2897_v56, %v2291_v57  ;;  %v2895_v59 = vld [vmem:[%s3563_s5 + $0xe4] sm:$0xf]  ;;  %v2283_v60 = vld [vmem:[%s3563_s5 + $0xe8] sm:$0xf0]  ;;  %v2893_v1 = vld [vmem:[%s3563_s5 + $0xd4] sm:$0xf] }
  0x1b   : > { %2165 = vmatmul.msk.bf16.vlgmr.msra.gmra.mxu0 %vm401_vm0, %v2858_v7  ;;  %569 = vmatpush.bf16.msra.mxu3 %v2847_v18  ;;  %v2286_v61 = vor.u32 %v2895_v59, %v2283_v60  ;;  %v2275_v2 = vld [vmem:[%s3563_s5 + $0xd8] sm:$0xf0]  ;;  %v2891_v5 = vld [vmem:[%s3563_s5 + $0xc4] sm:$0xf]  ;;  %v2267_v6 = vld [vmem:[%s3563_s5 + $0xc8] sm:$0xf0] }
  0x1c   : > { %v2278_v3 = vor.u32 %v2893_v1, %v2275_v2  ;;  %v2270_v7 = vor.u32 %v2891_v5, %v2267_v6  ;;  %v2355_v18 = vld [vmem:[%s3563_s5 + $0x78] sm:$0xf0]  ;;  %v2876_v33 = vld [vmem:[%s3563_s5 + $0x54] sm:$0xf]  ;;  %v2331_v38 = vld [vmem:[%s3563_s5 + $0x48] sm:$0xf0] }
  0x1d   : > { %v2323_v41 = vld [vmem:[%s3563_s5 + $0x38] sm:$0xf0]  ;;  %v2877_v44 = vld [vmem:[%s3563_s5 + $0x54] sm:$0xf0]  ;;  %v2870_v45 = vld [vmem:[%s3563_s5 + $0x24] sm:$0xf] }
  0x1e   : > { %514 = vmatpush.bf16.msrb.mxu2 %v2856_v9  ;;  %659 = vmatpush.bf16.msrb.mxu1 %v2863_v10  ;;  %v3033_v9 = vld [vmem:[%s3561_s3] ss:$0 sm:$0xff]  ;;  %v2315_v47 = vld [vmem:[%s3563_s5 + $0x28] sm:$0xf0]  ;;  %v2259_v50 = vld [vmem:[%s3563_s5 + $0xb8] sm:$0xf0] }
  0x1f   : > { %570 = vmatpush.bf16.msra.mxu3 %v2846_v21  ;;  %v2318_v48 = vor.u32 %v2870_v45, %v2315_v47  ;;  %v2329_v51 = vld [vmem:[%s3563_s5 + $0x40] sm:$0xf]  ;;  %v2875_v53 = vld [vmem:[%s3563_s5 + $0x44] sm:$0xf0]  ;;  %v2868_v54 = vld [vmem:[%s3563_s5 + $0x14] sm:$0xf] }
  0x20   : > { %v2330_v56 = vor.u32 %v2875_v53, %v2329_v51  ;;  %v2251_v59 = vld [vmem:[%s3563_s5 + $0xa8] sm:$0xf0]  ;;  %v2313_v6 = vld [vmem:[%s3563_s5 + $0x20] sm:$0xf]  ;;  %v2908_v45 = vld [vmem:[%s3563_s5 + $0x144] sm:$0xf] }
  0x21   : > { %v2299_v1 = vld [vmem:[%s3563_s5 + $0x8] sm:$0xf0]  ;;  %v2906_v51 = vld [vmem:[%s3563_s5 + $0x134] sm:$0xf]  ;;  %v2410_v53 = vld [vmem:[%s3563_s5 + $0x138] sm:$0xf0] }
  0x22   : > { %515 = vmatpush.bf16.msrb.mxu2 %v2855_v11  ;;  %660 = vmatpush.bf16.msrb.mxu1 %v2862_v12  ;;  %v2418_v47 = vld [vmem:[%s3563_s5 + $0x148] sm:$0xf0] }
  0x23   : > { %571 = vmatpush.bf16.msra.mxu3 %v2845_v22 }
  0x26   : > { %516 = vmatpush.bf16.msrb.mxu2 %v2854_v13  ;;  %661 = vmatpush.bf16.msrb.mxu1 %v2861_v14 }
  0x27   : > { %846 = vmatpush.bf16.msrb.mxu3 %v2290_v34  ;;  %v2339_v34 = vld [vmem:[%s3563_s5 + $0x58] sm:$0xf0] }
  0x28   : > { %v2342_v36 = vor.u32 %v2876_v33, %v2339_v34  ;;  %v2912_v33 = vld [vmem:[%s3563_s5 + $0x164] sm:$0xf] }
  0x2a   : > { %517 = vmatpush.bf16.msrb.mxu2 %v2853_v16  ;;  %662 = vmatpush.bf16.msrb.mxu1 %v2860_v17  ;;  %v2880_v17 = vld [vmem:[%s3563_s5 + $0x74] sm:$0xf] }
  0x2b   : > { %847 = vmatpush.bf16.msrb.mxu3 %v2282_v37  ;;  %v2874_v37 = vld [vmem:[%s3563_s5 + $0x44] sm:$0xf] }
  0x2c   : > { %v2334_v39 = vor.u32 %v2874_v37, %v2331_v38  ;;  %v2424_v37 = vld [vmem:[%s3563_s5 + $0x150] sm:$0xf]  ;;  %v2911_v38 = vld [vmem:[%s3563_s5 + $0x154] sm:$0xf0] }
  0x2e   : > { %518 = vmatpush.bf16.msrb.mxu2 %v2852_v19  ;;  %663 = vmatpush.bf16.msrb.mxu1 %v2859_v20  ;;  %v2353_v19 = vld [vmem:[%s3563_s5 + $0x70] sm:$0xf]  ;;  %v2881_v20 = vld [vmem:[%s3563_s5 + $0x74] sm:$0xf0] }
  0x2f   : > { %848 = vmatpush.bf16.msrb.mxu3 %v2274_v40  ;;  %v2872_v40 = vld [vmem:[%s3563_s5 + $0x34] sm:$0xf] }
  0x30   : > { %v2326_v42 = vor.u32 %v2872_v40, %v2323_v41  ;;  %v2425_v40 = vor.u32 %v2911_v38, %v2424_v37  ;;  %v2426_v41 = vld [vmem:[%s3563_s5 + $0x158] sm:$0xf0]  ;;  %v2565_v37 = vld [vmem:[#allocation2 + $0x1e0] sm:$0xf]  ;;  %v2977_v38 = vld [vmem:[#allocation2 + $0x1e4] sm:$0xf0] }
  0x32   : > { %860 = vmatpush.bf16.msra.mxu1 %v2294_v58  ;;  %v2887_v58 = vld [vmem:[%s3563_s5 + $0xa4] sm:$0xf] }
  0x33   : > { %849 = vmatpush.bf16.msrb.mxu3 %v2266_v43  ;;  %v2337_v43 = vld [vmem:[%s3563_s5 + $0x50] sm:$0xf]  ;;  %v2254_v60 = vor.u32 %v2887_v58, %v2251_v59  ;;  %v2402_v59 = vld [vmem:[%s3563_s5 + $0x128] sm:$0xf0] }
  0x36   : > { %861 = vmatpush.bf16.msra.mxu1 %v2286_v61  ;;  %v2321_v61 = vld [vmem:[%s3563_s5 + $0x30] sm:$0xf] }
  0x37   : > { %850 = vmatpush.bf16.msrb.mxu3 %v2258_v46  ;;  %v2338_v46 = vor.u32 %v2877_v44, %v2337_v43  ;;  %v2416_v43 = vld [vmem:[%s3563_s5 + $0x140] sm:$0xf]  ;;  %v2909_v44 = vld [vmem:[%s3563_s5 + $0x144] sm:$0xf0] }
  0x3a   : > { %862 = vmatpush.bf16.msra.mxu1 %v2278_v3  ;;  %v2885_v3 = vld [vmem:[%s3563_s5 + $0x94] sm:$0xf] }
  0x3b   : > { %851 = vmatpush.bf16.msrb.mxu3 %v2250_v49  ;;  %v2889_v49 = vld [vmem:[%s3563_s5 + $0xb4] sm:$0xf] }
  0x3e   : > { %863 = vmatpush.bf16.msra.mxu1 %v2270_v7  ;;  %v2871_v7 = vld [vmem:[%s3563_s5 + $0x24] sm:$0xf0] }
  0x3f   : > { %852 = vmatpush.bf16.msrb.mxu3 %v2242_v52  ;;  %v2262_v52 = vor.u32 %v2889_v49, %v2259_v50  ;;  %v2408_v49 = vld [vmem:[%s3563_s5 + $0x130] sm:$0xf]  ;;  %v2907_v50 = vld [vmem:[%s3563_s5 + $0x134] sm:$0xf0] }
  0x42   : > { %864 = vmatpush.bf16.msra.mxu1 %v2262_v52  ;;  %v2409_v52 = vor.u32 %v2907_v50, %v2408_v49 }
  0x43   : > { %853 = vmatpush.bf16.msrb.mxu3 %v2234_v55  ;;  %v2307_v55 = vld [vmem:[%s3563_s5 + $0x18] sm:$0xf0] }
  0x44   : > { %v2310_v57 = vor.u32 %v2868_v54, %v2307_v55  ;;  %v2413_v54 = vor.u32 %v2906_v51, %v2410_v53  ;;  %v2400_v55 = vld [vmem:[%s3563_s5 + $0x120] sm:$0xf]  ;;  %v2557_v51 = vld [vmem:[#allocation2 + $0x1d0] sm:$0xf] }
  0x46   : > { %865 = vmatpush.bf16.msra.mxu1 %v2254_v60 }
  0x96   : > { %v452_v23 = vpop.f32.mrf.mxu1 }
  0x98   : > { %v598_v24 = vpop.f32.mrf.mxu0 }
  0x9c   : > { %v414_v25 = vpop.f32.mrf.mxu2 }
  0x9e   : > { %v454_v26 = vpop.f32.mrf.mxu1 }
  0x9f   : > { %v457_v27 = vpack.c.bf16 %v454_v26, %v452_v23  ;;  %v2358_v23 = vor.u32 %v2880_v17, %v2355_v18  ;;  %v2878_v26 = vld [vmem:[%s3563_s5 + $0x64] sm:$0xf] }
  0xa0   : > { %v600_v28 = vpop.f32.mrf.mxu0 }
  0xa1   : > { %v603_v29 = vpack.c.bf16 %v600_v28, %v598_v24  ;;  %2133 = vmatmul.msk.bf16.vlgmr.msrb.gmra.mxu2 %vm507_vm1, %v457_v27  ;;  %v2347_v27 = vld [vmem:[%s3563_s5 + $0x68] sm:$0xf0]  ;;  %v2354_v28 = vor.u32 %v2881_v20, %v2353_v19 }
  0xa2   : > { %v2350_v32 = vor.u32 %v2878_v26, %v2347_v27  ;;  %v2915_v26 = vld [vmem:[%s3563_s5 + $0x174] sm:$0xf0]  ;;  %v2914_v27 = vld [vmem:[%s3563_s5 + $0x174] sm:$0xf] }
  0xa3   : > { %2202 = vmatmul.msk.bf16.vlgmr.msrb.gmra.mxu1 %vm507_vm1, %v603_v29  ;;  %v2882_v29 = vld [vmem:[%s3562_s4 + $0x8] sm:$0xff] }
  0xa4   : > { %v416_v30 = vpop.f32.mrf.mxu2 }
  0xa5   : > { %v419_v31 = vpack.c.bf16 %v416_v30, %v414_v25  ;;  %v2865_v25 = vld [vmem:[%s3562_s4] sm:$0xff] }
  0xa6   : > { %v2345_v30 = vld [vmem:[%s3563_s5 + $0x60] sm:$0xf] }
  0xa7   : > { %2158 = vmatmul.msk.bf16.vlgmr.msra.gmra.mxu3 %vm507_vm1, %v419_v31  ;;  %v2879_v31 = vld [vmem:[%s3563_s5 + $0x64] sm:$0xf0] }
  0xa8   : > { %v2346_v35 = vor.u32 %v2879_v31, %v2345_v30  ;;  %v2432_v31 = vld [vmem:[%s3563_s5 + $0x160] sm:$0xf] }
 0x120   : > { %v665_v63 = vpop.f32.mrf.mxu1 }
 0x124   : > { %v520_v62 = vpop.f32.mrf.mxu2 }
 0x128   : > { %v667_v13 = vpop.f32.mrf.mxu1 }
 0x12a   : > { %v573_v0 = vpop.f32.mrf.mxu3 }
 0x12b   : > { %v574_v4 = vadd.f32 %v573_v0, %v520_v62  ;;  %v2873_v62 = vld [vmem:[%s3563_s5 + $0x34] sm:$0xf0] }
 0x12c   : > { %v522_v10 = vpop.f32.mrf.mxu2  ;;  %v2322_v0 = vor.u32 %v2873_v62, %v2321_v61  ;;  %v2392_v61 = vld [vmem:[%s3563_s5 + $0x110] sm:$0xf]  ;;  %v2903_v62 = vld [vmem:[%s3563_s5 + $0x114] sm:$0xf0] }
 0x12d   : > { %v670_v8 = vadd.f32 %v665_v63, %v574_v4  ;;  %v2866_v63 = vld [vmem:[%s3563_s5 + $0x4] sm:$0xf]  ;;  %v2243_v4 = vld [vmem:[%s3563_s5 + $0x98] sm:$0xf0] }
 0x12e   : > { %v2302_v2 = vor.u32 %v2866_v63, %v2299_v1  ;;  %v2246_v5 = vor.u32 %v2885_v3, %v2243_v4  ;;  %v2902_v63 = vld [vmem:[%s3563_s5 + $0x114] sm:$0xf]  ;;  %v2394_v1 = vld [vmem:[%s3563_s5 + $0x118] sm:$0xf0]  ;;  %v2384_v3 = vld [vmem:[%s3563_s5 + $0x100] sm:$0xf] }
 0x12f   : > { %v676_v14 = vadd.f32 %v3033_v9, %v670_v8  ;;  %v2314_v8 = vor.u32 %v2871_v7, %v2313_v6  ;;  %v2901_v4 = vld [vmem:[%s3563_s5 + $0x104] sm:$0xf0]  ;;  %v2386_v7 = vld [vmem:[%s3563_s5 + $0x108] sm:$0xf0] }
 0x130   : > { %866 = vmatpush.bf16.msra.mxu1 %v2246_v5  ;;  %v2900_v5 = vld [vmem:[%s3563_s5 + $0x104] sm:$0xf]  ;;  %v2385_v6 = vor.u32 %v2901_v4, %v2384_v3 }
 0x131   : > { %v678_v21 = vmax.f32 %v676_v14, 0.0 }
 0x132   : > { %v575_v11 = vpop.f32.mrf.mxu3 }
 0x133   : > { %v576_v12 = vadd.f32 %v575_v11, %v522_v10  ;;  %v2235_v10 = vld [vmem:[%s3563_s5 + $0x88] sm:$0xf0] }
 0x135   : > { %v671_v15 = vadd.f32 %v667_v13, %v576_v12  ;;  %v2305_v12 = vld [vmem:[%s3563_s5 + $0x10] sm:$0xf]  ;;  %v2869_v13 = vld [vmem:[%s3563_s5 + $0x14] sm:$0xf0] }
 0x136   : > { %v2306_v14 = vor.u32 %v2869_v13, %v2305_v12 }
 0x137   : > { %v677_v16 = vadd.f32 %v3033_v9, %v671_v15  ;;  %v2883_v9 = vld [vmem:[%s3563_s5 + $0x84] sm:$0xf]  ;;  %v2297_v15 = vld [vmem:[%s3563_s5] sm:$0xf] }
 0x138   : > { %v2238_v11 = vor.u32 %v2883_v9, %v2235_v10 }
 0x139   : > { %v679_v22 = vmax.f32 %v677_v16, 0.0  ;;  %v2867_v16 = vld [vmem:[%s3563_s5 + $0x4] sm:$0xf0] }
 0x13a   : > { %867 = vmatpush.bf16.msra.mxu1 %v2238_v11  ;;  %v2298_v17 = vor.u32 %v2867_v16, %v2297_v15 }
 0x13b   : > { %v680_v24 = vpack.c.bf16 %v679_v22, %v678_v21 }
 0x13d   : > { %699 = vmatpush.bf16.msrb.mxu0 %v680_v24  ;;  %741 = vmatpush.bf16.msra.mxu2 %v680_v24 }
 0x13e   : > { %1000 = vmatpush.bf16.msra.mxu3 %v680_v24  ;;  %v2899_v24 = vld [vmem:[%s3562_s4 + $0x10] sm:$0xff] }
 0x140   : > { %2207 = vmatmul.msk.bf16.vlgmr.msrb.gmra.mxu0 %vm688_vm2, %v2865_v25  ;;  %2214 = vmatmul.msk.bf16.vlgmr.msra.gmra.mxu2 %vm688_vm2, %v2882_v29  ;;  %v2440_v25 = vld [vmem:[%s3563_s5 + $0x170] sm:$0xf]  ;;  %v2442_v29 = vld [vmem:[%s3563_s5 + $0x178] sm:$0xf0] }
 0x141   : > { %968 = vmatpush.bf16.msrb.mxu2 %v2358_v23  ;;  %954 = vmatpush.bf16.msra.mxu0 %v2354_v28  ;;  %v2441_v28 = vor.u32 %v2915_v26, %v2440_v25  ;;  %v2445_v30 = vor.u32 %v2914_v27, %v2442_v29  ;;  %v2509_v26 = vld [vmem:[#allocation2 + $0x170] sm:$0xf]  ;;  %v2963_v27 = vld [vmem:[#allocation2 + $0x174] sm:$0xf0] }
 0x143   : > { %1105 = vmatpush.bf16.msrb.mxu1 %v2441_v28  ;;  %v2573_v28 = vld [vmem:[#allocation2 + $0x1f0] sm:$0xf] }
 0x145   : > { %969 = vmatpush.bf16.msrb.mxu2 %v2350_v32  ;;  %955 = vmatpush.bf16.msra.mxu0 %v2346_v35  ;;  %v2913_v32 = vld [vmem:[%s3563_s5 + $0x164] sm:$0xf0]  ;;  %v2434_v35 = vld [vmem:[%s3563_s5 + $0x168] sm:$0xf0] }
 0x146   : > { %v2433_v34 = vor.u32 %v2913_v32, %v2432_v31  ;;  %v2510_v32 = vor.u32 %v2963_v27, %v2509_v26  ;;  %v2969_v27 = vld [vmem:[#allocation2 + $0x1a4] sm:$0xf0] }
 0x148   : > { %1106 = vmatpush.bf16.msrb.mxu1 %v2433_v34  ;;  %v2501_v34 = vld [vmem:[#allocation2 + $0x160] sm:$0xf] }
 0x149   : > { %970 = vmatpush.bf16.msrb.mxu2 %v2342_v36  ;;  %956 = vmatpush.bf16.msra.mxu0 %v2338_v46  ;;  %v2437_v36 = vor.u32 %v2912_v33, %v2434_v35  ;;  %v2417_v46 = vor.u32 %v2909_v44, %v2416_v43  ;;  %v2979_v33 = vld [vmem:[#allocation2 + $0x1f4] sm:$0xf0]  ;;  %v2566_v44 = vor.u32 %v2977_v38, %v2565_v37  ;;  %v2525_v37 = vld [vmem:[#allocation2 + $0x190] sm:$0xf] }
 0x14a   : > { %v2574_v35 = vor.u32 %v2979_v33, %v2573_v28  ;;  %v2958_v28 = vld [vmem:[#allocation2 + $0x154] sm:$0xf]  ;;  %v2461_v33 = vld [vmem:[#allocation2 + $0x110] sm:$0xf] }
 0x14c   : > { %1107 = vmatpush.bf16.msrb.mxu1 %v2425_v40 }
 0x14d   : > { %971 = vmatpush.bf16.msrb.mxu2 %v2334_v39  ;;  %957 = vmatpush.bf16.msra.mxu0 %v2330_v56  ;;  %v2910_v39 = vld [vmem:[%s3563_s5 + $0x154] sm:$0xf]  ;;  %v2905_v56 = vld [vmem:[%s3563_s5 + $0x124] sm:$0xf0] }
 0x14e   : > { %v2401_v58 = vor.u32 %v2905_v56, %v2400_v55 }
 0x150   : > { %1108 = vmatpush.bf16.msrb.mxu1 %v2417_v46  ;;  %v2959_v46 = vld [vmem:[#allocation2 + $0x154] sm:$0xf0] }
 0x151   : > { %972 = vmatpush.bf16.msrb.mxu2 %v2326_v42  ;;  %958 = vmatpush.bf16.msra.mxu0 %v2322_v0  ;;  %v2429_v42 = vor.u32 %v2910_v39, %v2426_v41  ;;  %v2393_v0 = vor.u32 %v2903_v62, %v2392_v61 }
 0x154   : > { %1109 = vmatpush.bf16.msrb.mxu1 %v2409_v52  ;;  %v2975_v52 = vld [vmem:[#allocation2 + $0x1d4] sm:$0xf0] }
 0x155   : > { %973 = vmatpush.bf16.msrb.mxu2 %v2318_v48  ;;  %959 = vmatpush.bf16.msra.mxu0 %v2314_v8  ;;  %v2421_v48 = vor.u32 %v2908_v45, %v2418_v47  ;;  %v2389_v8 = vor.u32 %v2900_v5, %v2386_v7  ;;  %v2493_v45 = vld [vmem:[#allocation2 + $0x150] sm:$0xf]  ;;  %v2558_v56 = vor.u32 %v2975_v52, %v2557_v51  ;;  %v2575_v7 = vld [vmem:[#allocation2 + $0x1f8] sm:$0xf0] }
 0x156   : > { %v2494_v55 = vor.u32 %v2959_v46, %v2493_v45  ;;  %v2453_v45 = vld [vmem:[#allocation2 + $0x100] sm:$0xf]  ;;  %v2949_v46 = vld [vmem:[#allocation2 + $0x104] sm:$0xf0]  ;;  %v2637_v52 = vld [vmem:[#allocation2 + $0x70] sm:$0xf] }
 0x158   : > { %1110 = vmatpush.bf16.msrb.mxu1 %v2401_v58  ;;  %v2957_v58 = vld [vmem:[#allocation2 + $0x144] sm:$0xf0] }
 0x159   : > { %974 = vmatpush.bf16.msrb.mxu2 %v2310_v57  ;;  %960 = vmatpush.bf16.msra.mxu0 %v2306_v14  ;;  %v2904_v57 = vld [vmem:[%s3563_s5 + $0x124] sm:$0xf] }
 0x15a   : > { %v2405_v60 = vor.u32 %v2904_v57, %v2402_v59  ;;  %v2485_v57 = vld [vmem:[#allocation2 + $0x140] sm:$0xf] }
 0x15b   : > { %v2486_v5 = vor.u32 %v2957_v58, %v2485_v57  ;;  %v2954_v57 = vld [vmem:[#allocation2 + $0x134] sm:$0xf]  ;;  %v2479_v58 = vld [vmem:[#allocation2 + $0x138] sm:$0xf0] }
 0x15c   : > { %1111 = vmatpush.bf16.msrb.mxu1 %v2393_v0  ;;  %v2973_v0 = vld [vmem:[#allocation2 + $0x1c4] sm:$0xf0] }
 0x15d   : > { %975 = vmatpush.bf16.msrb.mxu2 %v2302_v2  ;;  %961 = vmatpush.bf16.msra.mxu0 %v2298_v17  ;;  %v2397_v2 = vor.u32 %v2902_v63, %v2394_v1  ;;  %v2549_v63 = vld [vmem:[#allocation2 + $0x1c0] sm:$0xf]  ;;  %v2962_v1 = vld [vmem:[#allocation2 + $0x174] sm:$0xf] }
 0x160   : > { %1112 = vmatpush.bf16.msrb.mxu1 %v2385_v6  ;;  %v2978_v6 = vld [vmem:[#allocation2 + $0x1f4] sm:$0xf] }
 0x161   : > { %1119 = vmatpush.bf16.msrb.mxu0 %v2445_v30 }
 0x165   : > { %1120 = vmatpush.bf16.msrb.mxu0 %v2437_v36  ;;  %v2961_v36 = vld [vmem:[#allocation2 + $0x164] sm:$0xf0] }
 0x166   : > { %v2502_v41 = vor.u32 %v2961_v36, %v2501_v34  ;;  %v2951_v34 = vld [vmem:[#allocation2 + $0x114] sm:$0xf0] }
 0x169   : > { %1121 = vmatpush.bf16.msrb.mxu0 %v2429_v42 }
 0x16d   : > { %1122 = vmatpush.bf16.msrb.mxu0 %v2421_v48 }
 0x171   : > { %1123 = vmatpush.bf16.msrb.mxu0 %v2413_v54 }
 0x175   : > { %1124 = vmatpush.bf16.msrb.mxu0 %v2405_v60 }
 0x179   : > { %1125 = vmatpush.bf16.msrb.mxu0 %v2397_v2  ;;  %v2511_v2 = vld [vmem:[#allocation2 + $0x178] sm:$0xf0] }
 0x17d   : > { %1126 = vmatpush.bf16.msrb.mxu0 %v2389_v8  ;;  %v2477_v8 = vld [vmem:[#allocation2 + $0x130] sm:$0xf] }
 0x1bd   : > { %v701_v18 = vpop.f32.mrf.mxu0 }
 0x1c3   : > { %v743_v19 = vpop.f32.mrf.mxu2 }
 0x1c5   : > { %v703_v20 = vpop.f32.mrf.mxu0 }
 0x1c6   : > { %v706_v21 = vpack.c.bf16 %v703_v20, %v701_v18  ;;  %v1137_v20 = vld [vmem:[%s3564_s6] sm:$0x3] }
 0x1c7   : > { %v1140_v31 = vperm.slane %v1137_v20, 1 }
 0x1c8   : > { %976 = vmatmul.bf16.vlgmr.msrb.gmra.mxu2 %v706_v21  ;;  %962 = vmatmul.bf16.vlgmr.msra.gmra.mxu0 %v706_v21 }
 0x1c9   : > { %1456 = vmatpush.bf16.msra.mxu0 %v2574_v35 }
 0x1cb   : > { %v745_v22 = vpop.f32.mrf.mxu2 }
 0x1cc   : > { %v748_v23 = vpack.c.bf16 %v745_v22, %v743_v19 }
 0x1cd   : > { %1457 = vmatpush.bf16.msra.mxu0 %v2566_v44  ;;  %v2551_v44 = vld [vmem:[#allocation2 + $0x1c8] sm:$0xf0] }
 0x1ce   : > { %854 = vmatmul.bf16.vlgmr.msrb.gmra.mxu3 %v748_v23  ;;  %868 = vmatmul.bf16.vlgmr.msra.gmra.mxu1 %v748_v23 }
 0x1cf   : > { %1443 = vmatpush.bf16.msra.mxu1 %v2510_v32  ;;  %v2559_v32 = vld [vmem:[#allocation2 + $0x1d8] sm:$0xf0] }
 0x1d1   : > { %1458 = vmatpush.bf16.msra.mxu0 %v2558_v56  ;;  %v2947_v56 = vld [vmem:[#allocation2 + $0xf4] sm:$0xf0] }
 0x1d3   : > { %1444 = vmatpush.bf16.msra.mxu1 %v2502_v41  ;;  %v2487_v41 = vld [vmem:[#allocation2 + $0x148] sm:$0xf0] }
 0x1d7   : > { %1445 = vmatpush.bf16.msra.mxu1 %v2494_v55  ;;  %v2454_v55 = vor.u32 %v2949_v46, %v2453_v45 }
 0x1db   : > { %1446 = vmatpush.bf16.msra.mxu1 %v2486_v5  ;;  %v2929_v5 = vld [vmem:[#allocation2 + $0x64] sm:$0xf0] }
 0x1de   : > { %2365 = vmatmul.msk.bf16.vlgmr.msra.gmra.mxu3 %vm688_vm2, %v2899_v24  ;;  %v1139_v24 = vperm.slane %v1137_v20, 0  ;;  %v2567_v20 = vld [vmem:[#allocation2 + $0x1e8] sm:$0xf0] }
 0x245   : > { %v963_v15 = vpop.f32.mrf.mxu0 }
 0x24b   : > { %v869_v14 = vpop.f32.mrf.mxu1  ;;  %v977_v18 = vpop.f32.mrf.mxu2 }
 0x24c   : > { %v978_v22 = vadd.f32 %v977_v18, %v869_v14  ;;  %v2578_v14 = vor.u32 %v2978_v6, %v2575_v7  ;;  %v2693_v6 = vld [vmem:[#allocation2 + $0xe0] sm:$0xf] }
 0x24d   : > { %v965_v17 = vpop.f32.mrf.mxu0 }
 0x251   : > { %v855_v9 = vpop.f32.mrf.mxu3 }
 0x252   : > { %v964_v23 = vadd.f32 %v963_v15, %v855_v9  ;;  %v2955_v9 = vld [vmem:[#allocation2 + $0x134] sm:$0xf0] }
 0x253   : > { %v871_v16 = vpop.f32.mrf.mxu1  ;;  %v979_v25 = vpop.f32.mrf.mxu2  ;;  %v2971_v15 = vld [vmem:[#allocation2 + $0x1b4] sm:$0xf0]  ;;  %v2478_v18 = vor.u32 %v2955_v9, %v2477_v8  ;;  %v2945_v8 = vld [vmem:[#allocation2 + $0xe4] sm:$0xf0]  ;;  %v2952_v9 = vld [vmem:[#allocation2 + $0x124] sm:$0xf] }
 0x254   : > { %v980_v39 = vadd.f32 %v979_v25, %v871_v16  ;;  %v2960_v16 = vld [vmem:[#allocation2 + $0x164] sm:$0xf]  ;;  %v2533_v25 = vld [vmem:[#allocation2 + $0x1a0] sm:$0xf] }
 0x255   : > { %1447 = vmatpush.bf16.msra.mxu1 %v2478_v18  ;;  %v2534_v35 = vor.u32 %v2969_v27, %v2533_v25  ;;  %v2685_v18 = vld [vmem:[#allocation2 + $0xd0] sm:$0xf] }
 0x259   : > { %v857_v10 = vpop.f32.mrf.mxu3 }
 0x25a   : > { %v966_v40 = vadd.f32 %v965_v17, %v857_v10  ;;  %v1153_v10 = vld [vmem:[%s3565_s7] sm:$0xf]  ;;  %v2503_v17 = vld [vmem:[#allocation2 + $0x168] sm:$0xf0] }
 0x261   : > { %v1002_v11 = vpop.f32.mrf.mxu3 }
 0x269   : > { %v1004_v12 = vpop.f32.mrf.mxu3 }
 0x26a   : > { %v1007_v13 = vpack.c.bf16 %v1004_v12, %v1002_v11  ;;  %v2550_v11 = vor.u32 %v2973_v0, %v2549_v63  ;;  %v2514_v12 = vor.u32 %v2962_v1, %v2511_v2  ;;  %v2482_v1 = vor.u32 %v2954_v57, %v2479_v58  ;;  %v2629_v2 = vld [vmem:[#allocation2 + $0x60] sm:$0xf]  ;;  %v2695_v57 = vld [vmem:[#allocation2 + $0xe8] sm:$0xf0] }
 0x26c   : > { %1113 = vmatmul.bf16.vlgmr.msrb.gmra.mxu1 %v1007_v13  ;;  %1127 = vmatmul.bf16.vlgmr.msrb.gmra.mxu0 %v1007_v13  ;;  %v2541_v13 = vld [vmem:[#allocation2 + $0x1b0] sm:$0xf] }
 0x26d   : > { %1459 = vmatpush.bf16.msra.mxu0 %v2550_v11  ;;  %v2968_v11 = vld [vmem:[#allocation2 + $0x1a4] sm:$0xf] }
 0x2e9   : > { %v1114_v19 = vpop.f32.mrf.mxu1  ;;  %v1128_v21 = vpop.f32.mrf.mxu0 }
 0x2ea   : > { %v1133_v29 = vadd.f32 %v1114_v19, %v964_v23  ;;  %v1134_v30 = vadd.f32 %v1128_v21, %v978_v22  ;;  %v2976_v19 = vld [vmem:[#allocation2 + $0x1e4] sm:$0xf]  ;;  %v2469_v21 = vld [vmem:[#allocation2 + $0x120] sm:$0xf]  ;;  %v2953_v22 = vld [vmem:[#allocation2 + $0x124] sm:$0xf0]  ;;  %v2542_v23 = vor.u32 %v2971_v15, %v2541_v13  ;;  %v2630_v13 = vor.u32 %v2929_v5, %v2629_v2 }
 0x2eb   : > { %v2570_v26 = vor.u32 %v2976_v19, %v2567_v20  ;;  %v2943_v20 = vld [vmem:[#allocation2 + $0xd4] sm:$0xf0] }
 0x2ec   : > { %v1143_v47 = vadd.f32 %v1139_v24, %v1133_v29  ;;  %v1144_v48 = vadd.f32 %v1140_v31, %v1134_v30  ;;  %v2495_v29 = vld [vmem:[#allocation2 + $0x158] sm:$0xf0]  ;;  %v2470_v30 = vor.u32 %v2953_v22, %v2469_v21  ;;  %1460 = vmatpush.bf16.msra.mxu0 %v2542_v23  ;;  %v2950_v21 = vld [vmem:[#allocation2 + $0x114] sm:$0xf] }
 0x2ed   : > { %v2498_v36 = vor.u32 %v2958_v28, %v2495_v29  ;;  %v2463_v22 = vld [vmem:[#allocation2 + $0x118] sm:$0xf0]  ;;  %v2966_v23 = vld [vmem:[#allocation2 + $0x194] sm:$0xf]  ;;  %v2613_v29 = vld [vmem:[#allocation2 + $0x40] sm:$0xf] }
 0x2ee   : > { %v1147_v59 = vmax.f32 %v1143_v47, 0.0  ;;  %v1148_v60 = vmax.f32 %v1144_v48, 0.0  ;;  %1448 = vmatpush.bf16.msra.mxu1 %v2470_v30  ;;  %v2466_v27 = vor.u32 %v2950_v21, %v2463_v22  ;;  %v2925_v30 = vld [vmem:[#allocation2 + $0x44] sm:$0xf0]  ;;  %v2581_v21 = vld [vmem:[#allocation2] sm:$0xf] }
 0x2ef   : > { %v2917_v22 = vld [vmem:[#allocation2 + $0x4] sm:$0xf0] }
 0x2f0   : > { %1461 = vmatpush.bf16.msra.mxu0 %v2534_v35  ;;  %v2455_v35 = vld [vmem:[#allocation2 + $0x108] sm:$0xf0] }
 0x2f1   : > { %v1116_v42 = vpop.f32.mrf.mxu1  ;;  %v1130_v43 = vpop.f32.mrf.mxu0 }
 0x2f2   : > { %v1135_v49 = vadd.f32 %v1116_v42, %v966_v40  ;;  %v1136_v50 = vadd.f32 %v1130_v43, %v980_v39  ;;  %v2967_v39 = vld [vmem:[#allocation2 + $0x194] sm:$0xf0]  ;;  %v2956_v40 = vld [vmem:[#allocation2 + $0x144] sm:$0xf]  ;;  %v2462_v42 = vor.u32 %v2951_v34, %v2461_v33  ;;  %v2941_v33 = vld [vmem:[#allocation2 + $0xc4] sm:$0xf0] }
 0x2f3   : > { %v2972_v43 = vld [vmem:[#allocation2 + $0x1c4] sm:$0xf]  ;;  %v2526_v47 = vor.u32 %v2967_v39, %v2525_v37  ;;  %v2490_v48 = vor.u32 %v2956_v40, %v2487_v41  ;;  %v2519_v39 = vld [vmem:[#allocation2 + $0x188] sm:$0xf0]  ;;  %v2930_v40 = vld [vmem:[#allocation2 + $0x74] sm:$0xf] }
 0x2f4   : > { %v1145_v53 = vadd.f32 %v1139_v24, %v1135_v49  ;;  %v1146_v54 = vadd.f32 %v1140_v31, %v1136_v50  ;;  %v2506_v24 = vor.u32 %v2960_v16, %v2503_v17  ;;  %v2974_v31 = vld [vmem:[#allocation2 + $0x1d4] sm:$0xf]  ;;  %v2517_v49 = vld [vmem:[#allocation2 + $0x180] sm:$0xf]  ;;  %v2965_v50 = vld [vmem:[#allocation2 + $0x184] sm:$0xf0]  ;;  %v2554_v51 = vor.u32 %v2972_v43, %v2551_v44  ;;  %1449 = vmatpush.bf16.msra.mxu1 %v2462_v42 }
 0x2f5   : > { %v2562_v38 = vor.u32 %v2974_v31, %v2559_v32  ;;  %1462 = vmatpush.bf16.msra.mxu0 %v2526_v47  ;;  %v2621_v16 = vld [vmem:[#allocation2 + $0x50] sm:$0xf]  ;;  %v2927_v17 = vld [vmem:[#allocation2 + $0x54] sm:$0xf0]  ;;  %v2677_v31 = vld [vmem:[#allocation2 + $0xc0] sm:$0xf]  ;;  %v2614_v32 = vor.u32 %v2925_v30, %v2613_v29 }
 0x2f6   : > { %v1149_v61 = vmax.f32 %v1145_v53, 0.0  ;;  %v1150_v62 = vmax.f32 %v1146_v54, 0.0  ;;  %v2931_v53 = vld [vmem:[#allocation2 + $0x74] sm:$0xf0]  ;;  %v2701_v54 = vld [vmem:[#allocation2 + $0xf0] sm:$0xf]  ;;  %v2622_v25 = vor.u32 %v2927_v17, %v2621_v16 }
 0x2f7   : > { %v2638_v63 = vor.u32 %v2931_v53, %v2637_v52  ;;  %v2702_v0 = vor.u32 %v2947_v56, %v2701_v54  ;;  %v2948_v34 = vld [vmem:[#allocation2 + $0x104] sm:$0xf]  ;;  %v2639_v42 = vld [vmem:[#allocation2 + $0x78] sm:$0xf0]  ;;  %v2946_v43 = vld [vmem:[#allocation2 + $0xf4] sm:$0xf] }
 0x2f8   : > { %v3522_v3 = vpack.c.bf16 %v1149_v61, %v1147_v59  ;;  %v3524_v4 = vpack.c.bf16 %v1150_v62, %v1148_v60  ;;  %v2970_v59 = vld [vmem:[#allocation2 + $0x1b4] sm:$0xf]  ;;  %v2543_v60 = vld [vmem:[#allocation2 + $0x1b8] sm:$0xf0]  ;;  %v2448_v61 = vld [vmem:[%s3565_s7 + $0x4] sm:$0xf]  ;;  %v2518_v62 = vor.u32 %v2965_v50, %v2517_v49  ;;  %1450 = vmatpush.bf16.msra.mxu1 %v2454_v55  ;;  %v2458_v37 = vor.u32 %v2948_v34, %v2455_v35 }
 0x2f9   : > { %v2546_v7 = vor.u32 %v2970_v59, %v2543_v60  ;;  %v2703_v44 = vld [vmem:[#allocation2 + $0xf8] sm:$0xf0]  ;;  %v2642_v45 = vor.u32 %v2930_v40, %v2639_v42  ;;  %v2605_v47 = vld [vmem:[#allocation2 + $0x30] sm:$0xf]  ;;  %v2928_v53 = vld [vmem:[#allocation2 + $0x64] sm:$0xf] }
 0x2fa   : > { %1164 = vmatpush.bf16.msra.mxu2 %v3522_v3  ;;  %1177 = vmatpush.bf16.msrb.mxu3 %v3524_v4  ;;  %v2706_v46 = vor.u32 %v2946_v43, %v2703_v44  ;;  %v2669_v49 = vld [vmem:[#allocation2 + $0xb0] sm:$0xf]  ;;  %v2631_v54 = vld [vmem:[#allocation2 + $0x68] sm:$0xf0]  ;;  %v2944_v55 = vld [vmem:[#allocation2 + $0xe4] sm:$0xf] }
 0x2fb   : > { %1463 = vmatpush.bf16.msra.mxu0 %v2518_v62  ;;  %v2634_v56 = vor.u32 %v2928_v53, %v2631_v54  ;;  %v2698_v58 = vor.u32 %v2944_v55, %v2695_v57  ;;  %v2597_v59 = vld [vmem:[#allocation2 + $0x20] sm:$0xf]  ;;  %v2921_v60 = vld [vmem:[#allocation2 + $0x24] sm:$0xf0]  ;;  %v2615_v16 = vld [vmem:[#allocation2 + $0x48] sm:$0xf0] }
 0x2fc   : > { %1655 = vmatpush.bf16.msrb.mxu1 %v2638_v63  ;;  %v2598_v62 = vor.u32 %v2921_v60, %v2597_v59  ;;  %v2937_v63 = vld [vmem:[#allocation2 + $0xa4] sm:$0xf0]  ;;  %v2940_v17 = vld [vmem:[#allocation2 + $0xc4] sm:$0xf]  ;;  %v2938_v29 = vld [vmem:[#allocation2 + $0xb4] sm:$0xf] }
 0x2fd   : > { %2446 = vmatmul.msk.bf16.vlgmr.msra.gmra.mxu2 %vm688_vm2, %v1153_v10  ;;  %2447 = vmatmul.msk.bf16.vlgmr.msrb.gmra.mxu3 %vm688_vm2, %v1153_v10  ;;  %v2471_v10 = vld [vmem:[#allocation2 + $0x128] sm:$0xf0]  ;;  %v2936_v35 = vld [vmem:[#allocation2 + $0xa4] sm:$0xf]  ;;  %v2591_v40 = vld [vmem:[#allocation2 + $0x18] sm:$0xf0] }
 0x2fe   : > { %1229 = vmatpush.bf16.msrb.mxu2 %v3522_v3  ;;  %1242 = vmatpush.bf16.msra.mxu3 %v3524_v4  ;;  %v2474_v15 = vor.u32 %v2952_v9, %v2471_v10  ;;  %v2919_v10 = vld [vmem:[#allocation2 + $0x14] sm:$0xf0]  ;;  %v2599_v34 = vld [vmem:[#allocation2 + $0x28] sm:$0xf0]  ;;  %v2655_v42 = vld [vmem:[#allocation2 + $0x98] sm:$0xf0] }
 0x2ff   : > { %1668 = vmatpush.bf16.msrb.mxu0 %v2702_v0  ;;  %v2926_v0 = vld [vmem:[#allocation2 + $0x54] sm:$0xf] }
 0x300   : > { %1656 = vmatpush.bf16.msrb.mxu1 %v2630_v13 }
 0x302   : > { %1469 = vmatpush.bf16.msra.mxu2 %v2514_v12  ;;  %1482 = vmatpush.bf16.msrb.mxu3 %v2578_v14  ;;  %v2535_v12 = vld [vmem:[#allocation2 + $0x1a8] sm:$0xf0]  ;;  %v2694_v14 = vor.u32 %v2945_v8, %v2693_v6  ;;  %v2942_v6 = vld [vmem:[#allocation2 + $0xd4] sm:$0xf]  ;;  %v2589_v8 = vld [vmem:[#allocation2 + $0x10] sm:$0xf] }
 0x303   : > { %v2538_v19 = vor.u32 %v2968_v11, %v2535_v12  ;;  %v2653_v11 = vld [vmem:[#allocation2 + $0x90] sm:$0xf]  ;;  %v2935_v12 = vld [vmem:[#allocation2 + $0x94] sm:$0xf0]  ;;  %v2590_v13 = vor.u32 %v2919_v10, %v2589_v8  ;;  %v2834_v10 = vld [vmem:[#allocation2 + $0x2f8] sm:$0xf0] }
 0x304   : > { %1669 = vmatpush.bf16.msrb.mxu0 %v2694_v14  ;;  %1657 = vmatpush.bf16.msrb.mxu1 %v2622_v25  ;;  %v2654_v14 = vor.u32 %v2935_v12, %v2653_v11  ;;  %v2933_v25 = vld [vmem:[#allocation2 + $0x84] sm:$0xf0]  ;;  %v2760_v12 = vld [vmem:[#allocation2 + $0x260] sm:$0xf] }
 0x306   : > { %1470 = vmatpush.bf16.msra.mxu2 %v2506_v24  ;;  %1483 = vmatpush.bf16.msrb.mxu3 %v2570_v26  ;;  %v2527_v24 = vld [vmem:[#allocation2 + $0x198] sm:$0xf0]  ;;  %v2686_v26 = vor.u32 %v2943_v20, %v2685_v18 }
 0x307   : > { %v2530_v28 = vor.u32 %v2966_v23, %v2527_v24  ;;  %v2645_v23 = vld [vmem:[#allocation2 + $0x80] sm:$0xf]  ;;  %v2582_v24 = vor.u32 %v2917_v22, %v2581_v21  ;;  %v3008_v21 = vld [vmem:[#allocation2 + $0x2e4] sm:$0xf]  ;;  %v2826_v22 = vld [vmem:[#allocation2 + $0x2e8] sm:$0xf0] }
 0x308   : > { %1670 = vmatpush.bf16.msrb.mxu0 %v2686_v26  ;;  %1658 = vmatpush.bf16.msrb.mxu1 %v2614_v32  ;;  %v2646_v26 = vor.u32 %v2933_v25, %v2645_v23  ;;  %v2752_v23 = vld [vmem:[#allocation2 + $0x250] sm:$0xf]  ;;  %v2991_v25 = vld [vmem:[#allocation2 + $0x254] sm:$0xf0] }
 0x30a   : > { %1471 = vmatpush.bf16.msra.mxu2 %v2498_v36  ;;  %1484 = vmatpush.bf16.msrb.mxu3 %v2562_v38  ;;  %v2678_v36 = vor.u32 %v2941_v33, %v2677_v31  ;;  %v2964_v38 = vld [vmem:[#allocation2 + $0x184] sm:$0xf]  ;;  %v2671_v31 = vld [vmem:[#allocation2 + $0xb8] sm:$0xf0] }
 0x30b   : > { %v2522_v41 = vor.u32 %v2964_v38, %v2519_v39  ;;  %v2674_v32 = vor.u32 %v2938_v29, %v2671_v31  ;;  %v2920_v33 = vld [vmem:[#allocation2 + $0x24] sm:$0xf]  ;;  %v2918_v39 = vld [vmem:[#allocation2 + $0x14] sm:$0xf]  ;;  %v2754_v31 = vld [vmem:[#allocation2 + $0x258] sm:$0xf0] }
 0x30c   : > { %1671 = vmatpush.bf16.msrb.mxu0 %v2678_v36  ;;  %v2602_v36 = vor.u32 %v2920_v33, %v2599_v34  ;;  %v2594_v43 = vor.u32 %v2918_v39, %v2591_v40  ;;  %v2818_v34 = vld [vmem:[#allocation2 + $0x2d8] sm:$0xf0]  ;;  %v3005_v40 = vld [vmem:[#allocation2 + $0x2c4] sm:$0xf0] }
 0x30d   : > { %2449 = vmatmul.msk.bf16.vlgmr.msrb.gmra.mxu2 %vm688_vm2, %v2448_v61  ;;  %2450 = vmatmul.msk.bf16.vlgmr.msra.gmra.mxu3 %vm688_vm2, %v2448_v61  ;;  %v2661_v61 = vld [vmem:[#allocation2 + $0xa0] sm:$0xf] }
 0x30e   : > { %1472 = vmatpush.bf16.msra.mxu2 %v2490_v48  ;;  %1485 = vmatpush.bf16.msrb.mxu3 %v2554_v51  ;;  %v2923_v48 = vld [vmem:[#allocation2 + $0x34] sm:$0xf0]  ;;  %v2662_v2 = vor.u32 %v2937_v63, %v2661_v61  ;;  %v2707_v63 = vld [vmem:[%s3565_s7 + $0x8] sm:$0xf] }
 0x30f   : > { %v2606_v50 = vor.u32 %v2923_v48, %v2605_v47  ;;  %v2939_v51 = vld [vmem:[#allocation2 + $0xb4] sm:$0xf0]  ;;  %v2932_v47 = vld [vmem:[#allocation2 + $0x84] sm:$0xf]  ;;  %v2647_v48 = vld [vmem:[#allocation2 + $0x88] sm:$0xf0] }
 0x310   : > { %v2670_v52 = vor.u32 %v2939_v51, %v2669_v49 }
 0x311   : > { %1659 = vmatpush.bf16.msrb.mxu1 %v2606_v50  ;;  %v2650_v50 = vor.u32 %v2932_v47, %v2647_v48  ;;  %v2736_v48 = vld [vmem:[#allocation2 + $0x230] sm:$0xf] }
 0x312   : > { %1473 = vmatpush.bf16.msra.mxu2 %v2482_v1  ;;  %1486 = vmatpush.bf16.msrb.mxu3 %v2546_v7  ;;  %v2623_v1 = vld [vmem:[#allocation2 + $0x58] sm:$0xf0] }
 0x313   : > { %1672 = vmatpush.bf16.msrb.mxu0 %v2670_v52  ;;  %v2626_v5 = vor.u32 %v2926_v0, %v2623_v1  ;;  %v2687_v7 = vld [vmem:[#allocation2 + $0xd8] sm:$0xf0]  ;;  %v2768_v0 = vld [vmem:[#allocation2 + $0x270] sm:$0xf] }
 0x314   : > { %v2690_v9 = vor.u32 %v2942_v6, %v2687_v7  ;;  %v2832_v1 = vld [vmem:[#allocation2 + $0x2f0] sm:$0xf]  ;;  %v2770_v6 = vld [vmem:[#allocation2 + $0x278] sm:$0xf0] }
 0x315   : > { %1660 = vmatpush.bf16.msrb.mxu1 %v2598_v62 }
 0x316   : > { %1474 = vmatpush.bf16.msra.mxu2 %v2474_v15  ;;  %1487 = vmatpush.bf16.msrb.mxu3 %v2538_v19  ;;  %v2924_v15 = vld [vmem:[#allocation2 + $0x44] sm:$0xf]  ;;  %v2679_v19 = vld [vmem:[#allocation2 + $0xc8] sm:$0xf0] }
 0x317   : > { %1673 = vmatpush.bf16.msrb.mxu0 %v2662_v2  ;;  %v2618_v18 = vor.u32 %v2924_v15, %v2615_v16  ;;  %v2682_v20 = vor.u32 %v2940_v17, %v2679_v19  ;;  %v3011_v2 = vld [vmem:[#allocation2 + $0x2f4] sm:$0xf0]  ;;  %v3009_v16 = vld [vmem:[#allocation2 + $0x2e4] sm:$0xf0]  ;;  %v2992_v17 = vld [vmem:[#allocation2 + $0x264] sm:$0xf] }
 0x318   : > { %v2833_v7 = vor.u32 %v3011_v2, %v2832_v1  ;;  %v2730_v1 = vld [vmem:[#allocation2 + $0x228] sm:$0xf0] }
 0x319   : > { %1661 = vmatpush.bf16.msrb.mxu1 %v2590_v13  ;;  %v2993_v13 = vld [vmem:[#allocation2 + $0x264] sm:$0xf0] }
 0x31a   : > { %1475 = vmatpush.bf16.msra.mxu2 %v2466_v27  ;;  %1488 = vmatpush.bf16.msrb.mxu3 %v2530_v28  ;;  %v2922_v27 = vld [vmem:[#allocation2 + $0x34] sm:$0xf]  ;;  %v2607_v28 = vld [vmem:[#allocation2 + $0x38] sm:$0xf0]  ;;  %v2761_v15 = vor.u32 %v2993_v13, %v2760_v12  ;;  %v2999_v12 = vld [vmem:[#allocation2 + $0x294] sm:$0xf0] }
 0x31b   : > { %1674 = vmatpush.bf16.msrb.mxu0 %v2654_v14  ;;  %v2610_v30 = vor.u32 %v2922_v27, %v2607_v28  ;;  %v2824_v14 = vld [vmem:[#allocation2 + $0x2e0] sm:$0xf]  ;;  %v3007_v27 = vld [vmem:[#allocation2 + $0x2d4] sm:$0xf0]  ;;  %v2753_v28 = vor.u32 %v2991_v25, %v2752_v23  ;;  %v2982_v13 = vld [vmem:[#allocation2 + $0x214] sm:$0xf] }
 0x31c   : > { %v2825_v19 = vor.u32 %v3009_v16, %v2824_v14  ;;  %v2722_v14 = vld [vmem:[#allocation2 + $0x218] sm:$0xf0] }
 0x31d   : > { %1662 = vmatpush.bf16.msrb.mxu1 %v2582_v24  ;;  %v2829_v24 = vor.u32 %v3008_v21, %v2826_v22  ;;  %v2725_v16 = vor.u32 %v2982_v13, %v2722_v14  ;;  %v2981_v21 = vld [vmem:[#allocation2 + $0x204] sm:$0xf0]  ;;  %v2776_v22 = vld [vmem:[#allocation2 + $0x280] sm:$0xf] }
 0x31e   : > { %1476 = vmatpush.bf16.msra.mxu2 %v2458_v37  ;;  %1489 = vmatpush.bf16.msrb.mxu3 %v2522_v41  ;;  %v2663_v37 = vld [vmem:[#allocation2 + $0xa8] sm:$0xf0]  ;;  %v2934_v41 = vld [vmem:[#allocation2 + $0x94] sm:$0xf] }
 0x31f   : > { %1675 = vmatpush.bf16.msrb.mxu0 %v2646_v26  ;;  %v2666_v38 = vor.u32 %v2936_v35, %v2663_v37  ;;  %v2658_v44 = vor.u32 %v2934_v41, %v2655_v42  ;;  %v2816_v26 = vld [vmem:[#allocation2 + $0x2d0] sm:$0xf]  ;;  %v2989_v37 = vld [vmem:[#allocation2 + $0x244] sm:$0xf0]  ;;  %v2988_v41 = vld [vmem:[#allocation2 + $0x244] sm:$0xf] }
 0x320   : > { %v2817_v29 = vor.u32 %v3007_v27, %v2816_v26  ;;  %v2746_v42 = vld [vmem:[#allocation2 + $0x248] sm:$0xf0]  ;;  %v2997_v26 = vld [vmem:[#allocation2 + $0x284] sm:$0xf0]  ;;  %v2980_v27 = vld [vmem:[#allocation2 + $0x204] sm:$0xf] }
 0x322   : > { %1681 = vmatpush.bf16.msrb.mxu2 %v2642_v45  ;;  %1694 = vmatpush.bf16.msra.mxu3 %v2706_v46  ;;  %v2916_v45 = vld [vmem:[#allocation2 + $0x4] sm:$0xf]  ;;  %v2583_v46 = vld [vmem:[#allocation2 + $0x8] sm:$0xf0] }
 0x323   : > { %v2586_v49 = vor.u32 %v2916_v45, %v2583_v46  ;;  %v3004_v45 = vld [vmem:[#allocation2 + $0x2c4] sm:$0xf]  ;;  %v2810_v46 = vld [vmem:[#allocation2 + $0x2c8] sm:$0xf0] }
 0x324   : > { %v2813_v47 = vor.u32 %v3004_v45, %v2810_v46 }
 0x326   : > { %1682 = vmatpush.bf16.msrb.mxu2 %v2634_v56  ;;  %1695 = vmatpush.bf16.msra.mxu3 %v2698_v58 }
 0x32a   : > { %1683 = vmatpush.bf16.msrb.mxu2 %v2626_v5  ;;  %1696 = vmatpush.bf16.msra.mxu3 %v2690_v9  ;;  %v2994_v5 = vld [vmem:[#allocation2 + $0x274] sm:$0xf] }
 0x32b   : > { %v2773_v8 = vor.u32 %v2994_v5, %v2770_v6  ;;  %v3010_v9 = vld [vmem:[#allocation2 + $0x2f4] sm:$0xf]  ;;  %v3000_v5 = vld [vmem:[#allocation2 + $0x2a4] sm:$0xf]  ;;  %v2794_v6 = vld [vmem:[#allocation2 + $0x2a8] sm:$0xf0] }
 0x32c   : > { %v2837_v11 = vor.u32 %v3010_v9, %v2834_v10  ;;  %v2983_v9 = vld [vmem:[#allocation2 + $0x214] sm:$0xf0]  ;;  %v2784_v10 = vld [vmem:[#allocation2 + $0x290] sm:$0xf] }
 0x32e   : > { %1684 = vmatpush.bf16.msrb.mxu2 %v2618_v18  ;;  %1697 = vmatpush.bf16.msra.mxu3 %v2682_v20  ;;  %v2762_v18 = vld [vmem:[#allocation2 + $0x268] sm:$0xf0] }
 0x32f   : > { %v2765_v20 = vor.u32 %v2992_v17, %v2762_v18  ;;  %v2998_v17 = vld [vmem:[#allocation2 + $0x294] sm:$0xf]  ;;  %v2786_v18 = vld [vmem:[#allocation2 + $0x298] sm:$0xf0] }
 0x332   : > { %1685 = vmatpush.bf16.msrb.mxu2 %v2610_v30  ;;  %1698 = vmatpush.bf16.msra.mxu3 %v2674_v32  ;;  %v2990_v30 = vld [vmem:[#allocation2 + $0x254] sm:$0xf] }
 0x333   : > { %v3006_v32 = vld [vmem:[#allocation2 + $0x2d4] sm:$0xf]  ;;  %v2757_v33 = vor.u32 %v2990_v30, %v2754_v31  ;;  %v2777_v30 = vor.u32 %v2997_v26, %v2776_v22 }
 0x334   : > { %v2821_v35 = vor.u32 %v3006_v32, %v2818_v34  ;;  %v2996_v32 = vld [vmem:[#allocation2 + $0x284] sm:$0xf] }
 0x336   : > { %1686 = vmatpush.bf16.msrb.mxu2 %v2602_v36  ;;  %1699 = vmatpush.bf16.msra.mxu3 %v2666_v38  ;;  %v2744_v36 = vld [vmem:[#allocation2 + $0x240] sm:$0xf] }
 0x337   : > { %v2808_v38 = vld [vmem:[#allocation2 + $0x2c0] sm:$0xf]  ;;  %v2745_v39 = vor.u32 %v2989_v37, %v2744_v36 }
 0x33a   : > { %1687 = vmatpush.bf16.msrb.mxu2 %v2594_v43  ;;  %1700 = vmatpush.bf16.msra.mxu3 %v2658_v44  ;;  %v2809_v43 = vor.u32 %v3005_v40, %v2808_v38  ;;  %v2749_v44 = vor.u32 %v2988_v41, %v2746_v42 }
 0x33e   : > { %1688 = vmatpush.bf16.msrb.mxu2 %v2586_v49  ;;  %1701 = vmatpush.bf16.msra.mxu3 %v2650_v50  ;;  %v2987_v49 = vld [vmem:[#allocation2 + $0x234] sm:$0xf0]  ;;  %v2800_v50 = vld [vmem:[#allocation2 + $0x2b0] sm:$0xf] }
 0x380   : > { %v1166_v51 = vpop.f32.mrf.mxu2  ;;  %v1179_v52 = vpop.f32.mrf.mxu3 }
 0x381   : > { %v1183_v61 = vpack.c.bf16 %v1166_v51, %v1166_v51  ;;  %v1184_v62 = vpack.c.bf16 %v1179_v52, %v1179_v52  ;;  %v2737_v51 = vor.u32 %v2987_v49, %v2736_v48  ;;  %v3003_v52 = vld [vmem:[#allocation2 + $0x2b4] sm:$0xf0] }
 0x388   : > { %v1168_v53 = vpop.f32.mrf.mxu2  ;;  %v1181_v54 = vpop.f32.mrf.mxu3 }
 0x389   : > { %v2986_v53 = vld [vmem:[#allocation2 + $0x234] sm:$0xf]  ;;  %v2738_v54 = vld [vmem:[#allocation2 + $0x238] sm:$0xf0] }
 0x390   : > { %v1231_v55 = vpop.f32.mrf.mxu2  ;;  %v1244_v56 = vpop.f32.mrf.mxu3 }
 0x391   : > { %v1248_v57 = vpack.c.bf16 %v1231_v55, %v1231_v55  ;;  %v1249_v58 = vpack.c.bf16 %v1244_v56, %v1244_v56  ;;  %v2801_v55 = vor.u32 %v3003_v52, %v2800_v50  ;;  %v2741_v56 = vor.u32 %v2986_v53, %v2738_v54 }
 0x393   : > { %1451 = vmatmul.bf16.vlgmr.msra.gmra.mxu1 %v1248_v57  ;;  %1464 = vmatmul.bf16.vlgmr.msra.gmra.mxu0 %v1249_v58 }
 0x394   : > { %1477 = vmatmul.bf16.vlgmr.msra.gmra.mxu2 %v1248_v57  ;;  %1490 = vmatmul.bf16.vlgmr.msrb.gmra.mxu3 %v1249_v58  ;;  %v3002_v57 = vld [vmem:[#allocation2 + $0x2b4] sm:$0xf]  ;;  %v2802_v58 = vld [vmem:[#allocation2 + $0x2b8] sm:$0xf0] }
 0x395   : > { %1719 = vmatpush.bf16.msra.mxu1 %v3522_v3  ;;  %1732 = vmatpush.bf16.msra.mxu0 %v3524_v4  ;;  %v2995_v3 = vld [vmem:[#allocation2 + $0x274] sm:$0xf0] }
 0x396   : > { %v2769_v4 = vor.u32 %v2995_v3, %v2768_v0  ;;  %1946 = vmatpush.bf16.msrb.mxu3 %v2833_v7  ;;  %v3001_v0 = vld [vmem:[#allocation2 + $0x2a4] sm:$0xf0]  ;;  %v2984_v3 = vld [vmem:[#allocation2 + $0x224] sm:$0xf]  ;;  %v2797_v7 = vor.u32 %v3000_v5, %v2794_v6 }
 0x397   : > { %v2733_v2 = vor.u32 %v2984_v3, %v2730_v1 }
 0x398   : > { %v1233_v59 = vpop.f32.mrf.mxu2  ;;  %v1246_v60 = vpop.f32.mrf.mxu3  ;;  %1933 = vmatpush.bf16.msra.mxu2 %v2769_v4 }
 0x399   : > { %v2805_v59 = vor.u32 %v3002_v57, %v2802_v58  ;;  %v2728_v60 = vld [vmem:[#allocation2 + $0x220] sm:$0xf] }
 0x39a   : > { %1947 = vmatpush.bf16.msrb.mxu3 %v2825_v19  ;;  %v2789_v19 = vor.u32 %v2998_v17, %v2786_v18 }
 0x39c   : > { %1934 = vmatpush.bf16.msra.mxu2 %v2761_v15  ;;  %v2785_v15 = vor.u32 %v2999_v12, %v2784_v10 }
 0x39e   : > { %1948 = vmatpush.bf16.msrb.mxu3 %v2817_v29 }
 0x3a0   : > { %1935 = vmatpush.bf16.msra.mxu2 %v2753_v28  ;;  %v2714_v28 = vld [vmem:[#allocation2 + $0x208] sm:$0xf0] }
 0x3a1   : > { %v2717_v31 = vor.u32 %v2980_v27, %v2714_v28 }
 0x3a2   : > { %1949 = vmatpush.bf16.msrb.mxu3 %v2809_v43 }
 0x3a3   : > { %1663 = vmatmul.bf16.vlgmr.msrb.gmra.mxu1 %v1183_v61  ;;  %1676 = vmatmul.bf16.vlgmr.msrb.gmra.mxu0 %v1184_v62 }
 0x3a4   : > { %1689 = vmatmul.bf16.vlgmr.msrb.gmra.mxu2 %v1183_v61  ;;  %1702 = vmatmul.bf16.vlgmr.msra.gmra.mxu3 %v1184_v62  ;;  %v2985_v61 = vld [vmem:[#allocation2 + $0x224] sm:$0xf0]  ;;  %v2792_v62 = vld [vmem:[#allocation2 + $0x2a0] sm:$0xf] }
 0x3a5   : > { %1959 = vmatpush.bf16.msrb.mxu1 %v2773_v8  ;;  %1972 = vmatpush.bf16.msrb.mxu0 %v2837_v11  ;;  %v2793_v4 = vor.u32 %v3001_v0, %v2792_v62  ;;  %v2720_v8 = vld [vmem:[#allocation2 + $0x210] sm:$0xf] }
 0x3a6   : > { %1936 = vmatpush.bf16.msra.mxu2 %v2745_v39  ;;  %1950 = vmatpush.bf16.msrb.mxu3 %v2801_v55  ;;  %v2721_v11 = vor.u32 %v2983_v9, %v2720_v8 }
 0x3a9   : > { %1960 = vmatpush.bf16.msrb.mxu1 %v2765_v20  ;;  %1973 = vmatpush.bf16.msrb.mxu0 %v2829_v24  ;;  %v2712_v20 = vld [vmem:[#allocation2 + $0x200] sm:$0xf] }
 0x3aa   : > { %1937 = vmatpush.bf16.msra.mxu2 %v2737_v51  ;;  %1951 = vmatpush.bf16.msrb.mxu3 %v2793_v4  ;;  %v2713_v25 = vor.u32 %v2981_v21, %v2712_v20 }
 0x3ad   : > { %1961 = vmatpush.bf16.msrb.mxu1 %v2757_v33  ;;  %1974 = vmatpush.bf16.msrb.mxu0 %v2821_v35  ;;  %v2778_v33 = vld [vmem:[#allocation2 + $0x288] sm:$0xf0] }
 0x3ae   : > { %1952 = vmatpush.bf16.msrb.mxu3 %v2785_v15  ;;  %v2781_v34 = vor.u32 %v2996_v32, %v2778_v33 }
 0x3b1   : > { %1962 = vmatpush.bf16.msrb.mxu1 %v2749_v44  ;;  %1975 = vmatpush.bf16.msrb.mxu0 %v2813_v47 }
 0x3b2   : > { %1953 = vmatpush.bf16.msrb.mxu3 %v2777_v30 }
 0x3b3   : > { %2708 = vmatmul.msk.bf16.vlgmr.msra.gmra.mxu1 %vm688_vm2, %v2707_v63  ;;  %2709 = vmatmul.msk.bf16.vlgmr.msra.gmra.mxu0 %vm688_vm2, %v2707_v63  ;;  %v2729_v63 = vor.u32 %v2985_v61, %v2728_v60  ;;  %v1987_v60 = vld [vmem:[%s3567_s9] sm:$0x3] }
 0x3b4   : > { %v1990_v0 = vperm.slane %v1987_v60, 1  ;;  %v1989_v6 = vperm.slane %v1987_v60, 0 }
 0x3b5   : > { %1963 = vmatpush.bf16.msrb.mxu1 %v2741_v56  ;;  %1976 = vmatpush.bf16.msrb.mxu0 %v2805_v59 }
 0x3b6   : > { %1938 = vmatpush.bf16.msra.mxu2 %v2729_v63 }
 0x3b9   : > { %1964 = vmatpush.bf16.msrb.mxu1 %v2733_v2  ;;  %1977 = vmatpush.bf16.msrb.mxu0 %v2797_v7 }
 0x3ba   : > { %1939 = vmatpush.bf16.msra.mxu2 %v2721_v11 }
 0x3bd   : > { %1965 = vmatpush.bf16.msrb.mxu1 %v2725_v16  ;;  %1978 = vmatpush.bf16.msrb.mxu0 %v2789_v19 }
 0x3be   : > { %1940 = vmatpush.bf16.msra.mxu2 %v2713_v25 }
 0x3c1   : > { %1966 = vmatpush.bf16.msrb.mxu1 %v2717_v31  ;;  %1979 = vmatpush.bf16.msrb.mxu0 %v2781_v34 }
 0x410   : > { %v1452_v23 = vpop.f32.mrf.mxu1  ;;  %v1465_v24 = vpop.f32.mrf.mxu0 }
 0x411   : > { %v1466_v29 = vadd.f32 %v1465_v24, %v1452_v23 }
 0x417   : > { %v1478_v35 = vpop.f32.mrf.mxu2  ;;  %v1491_v36 = vpop.f32.mrf.mxu3 }
 0x418   : > { %v1492_v37 = vadd.f32 %v1491_v36, %v1478_v35  ;;  %v1454_v38 = vpop.f32.mrf.mxu1  ;;  %v1467_v39 = vpop.f32.mrf.mxu0 }
 0x41f   : > { %v1480_v40 = vpop.f32.mrf.mxu2  ;;  %v1493_v41 = vpop.f32.mrf.mxu3 }
 0x420   : > { %v1664_v42 = vpop.f32.mrf.mxu1  ;;  %v1677_v43 = vpop.f32.mrf.mxu0 }
 0x421   : > { %v1665_v44 = vadd.f32 %v1664_v42, %v1466_v29 }
 0x423   : > { %v1678_v45 = vadd.f32 %v1677_v43, %v1665_v44 }
 0x427   : > { %v1690_v46 = vpop.f32.mrf.mxu2  ;;  %v1703_v47 = vpop.f32.mrf.mxu3 }
 0x428   : > { %v1691_v48 = vadd.f32 %v1690_v46, %v1492_v37  ;;  %v1666_v49 = vpop.f32.mrf.mxu1  ;;  %v1679_v50 = vpop.f32.mrf.mxu0 }
 0x42a   : > { %v1704_v51 = vadd.f32 %v1703_v47, %v1691_v48 }
 0x42f   : > { %v1692_v52 = vpop.f32.mrf.mxu2  ;;  %v1705_v53 = vpop.f32.mrf.mxu3 }
 0x430   : > { %v1721_v54 = vpop.f32.mrf.mxu1  ;;  %v1734_v55 = vpop.f32.mrf.mxu0 }
 0x431   : > { %v1738_v56 = vpack.c.bf16 %v1721_v54, %v1721_v54  ;;  %v1739_v57 = vpack.c.bf16 %v1734_v55, %v1734_v55 }
 0x433   : > { %1941 = vmatmul.bf16.vlgmr.msra.gmra.mxu2 %v1738_v56  ;;  %1954 = vmatmul.bf16.vlgmr.msrb.gmra.mxu3 %v1739_v57 }
 0x434   : > { %1967 = vmatmul.bf16.vlgmr.msrb.gmra.mxu1 %v1738_v56  ;;  %1980 = vmatmul.bf16.vlgmr.msrb.gmra.mxu0 %v1739_v57 }
 0x438   : > { %v1723_v58 = vpop.f32.mrf.mxu1  ;;  %v1736_v59 = vpop.f32.mrf.mxu0 }
 0x4b1   : > { %v1968_v61 = vpop.f32.mrf.mxu1  ;;  %v1981_v62 = vpop.f32.mrf.mxu0 }
 0x4b2   : > { %v1982_v63 = vadd.f32 %v1981_v62, %v1968_v61 }
 0x4b4   : > { %v1986_v3 = vadd.f32 %v1982_v63, %v1704_v51 }
 0x4b6   : > { %v1994_v1 = vadd.f32 %v1990_v0, %v1986_v3  ;;  %v1942_v4 = vpop.f32.mrf.mxu2  ;;  %v1955_v2 = vpop.f32.mrf.mxu3 }
 0x4b7   : > { %v1956_v5 = vadd.f32 %v1955_v2, %v1942_v4 }
 0x4b8   : > { %v1996_v7 = vmax.f32 %v1994_v1, 0.0 }
 0x4b9   : > { %v1985_v8 = vadd.f32 %v1956_v5, %v1678_v45  ;;  %v1970_v9 = vpop.f32.mrf.mxu1  ;;  %v1983_v10 = vpop.f32.mrf.mxu0 }
 0x4ba   : > { %1998 = vst [vmem:[%s376_s25 + $0x8] sm:$0xff] %v1996_v7 }
 0x4bb   : > { %v1993_v11 = vadd.f32 %v1989_v6, %v1985_v8 }
 0x4bd   : > { %v1995_v12 = vmax.f32 %v1993_v11, 0.0 }
 0x4be   : > { %v1944_v13 = vpop.f32.mrf.mxu2  ;;  %v1957_v14 = vpop.f32.mrf.mxu3 }
 0x4bf   : > { %1997 = vst [vmem:[%s376_s25] sm:$0xff] %v1995_v12 }
 0x4c0 PF: > { %s21_s13 = sadd.s32 1, %s3074_s13  }
 0x4c1   : > { %p18_p7 = scmp.ge.s32.totalorder %s21_s13, 4  }
 0x4c3   :  { %20 = sbr.rel (!%p18_p7) target bundleno = 1 (0x1), region = 107 }
 0x4c8   :  { %2020 = vsyncpa [#allocation3], 1 }
 0x4c9   :  { %2022 = vsyncpa [#allocation3 + $0x1], 1 }

</bundles_post_ra>
